<compile_context>
chip_gen: v6e
topology: v6e:2x2x1
jax: 0.10.0
libtpu: 0.0.40
codegen_flags: <defaults>
</compile_context>

<pallas_src>
import math
import functools

import jax
import jax.numpy as jnp
from jax import lax
from jax.experimental import pallas as pl
from jax.experimental.pallas import tpu as pltpu


# Per-kernel VMEM footprint here is only a few MB, so 32 MiB scoped limit
# leaves ample headroom for compiler scratch even on v7x (64 MiB physical).
_VMEM_LIMIT = 32 * 1024 * 1024
_MASK_VALUE = -1e9  # matches the PyTorch masked_fill(..., -1e9) semantics


def _pick_tile(dim, target, align):
    """Largest divisor of `dim` that is <= target and a multiple of `align`.

    Falls back to the full dim, which is always a legal block extent."""
    if dim <= target:
        return dim
    t = (min(target, dim) // align) * align
    while t >= align:
        if dim % t == 0:
            return t
        t -= align
    return dim


# ----------------------------------------------------------------------------
# Kernel 1 & 3: tiled linear  out = x @ w + b
#   bf16 operands on the MXU, K-resident f32 VMEM accumulator,
#   pl.when init/finalize, reduction axis last.
# ----------------------------------------------------------------------------
def _linear_kernel(x_ref, w_ref, b_ref, o_ref, acc_ref):
    ki = pl.program_id(2)

    @pl.when(ki == 0)
    def _():
        acc_ref[...] = jnp.zeros_like(acc_ref)

    acc_ref[...] += jnp.dot(x_ref[...], w_ref[...],
                            preferred_element_type=jnp.float32)

    @pl.when(ki == pl.num_programs(2) - 1)
    def _():
        o_ref[...] = (acc_ref[...] + b_ref[...]).astype(o_ref.dtype)


def linear(x, w, b, *, tm=512, tn=512, tk=512):
    M, K = x.shape
    K2, N = w.shape
    assert K == K2
    tm = _pick_tile(M, tm, 16)    # sublane dim of x / out (bf16 packing: 16)
    tn = _pick_tile(N, tn, 128)   # lane dim of w / out
    tk = _pick_tile(K, tk, 128)   # lane dim of x, sublane dim of w

    return pl.pallas_call(
        _linear_kernel,
        out_shape=jax.ShapeDtypeStruct((M, N), x.dtype),
        grid_spec=pltpu.PrefetchScalarGridSpec(
            num_scalar_prefetch=0,
            grid=(M // tm, N // tn, K // tk),
            in_specs=[
                pl.BlockSpec((tm, tk), lambda mi, ni, ki: (mi, ki)),
                pl.BlockSpec((tk, tn), lambda mi, ni, ki: (ki, ni)),
                pl.BlockSpec((1, tn), lambda mi, ni, ki: (0, ni)),
            ],
            out_specs=pl.BlockSpec((tm, tn), lambda mi, ni, ki: (mi, ni)),
            scratch_shapes=[pltpu.VMEM((tm, tn), jnp.float32)],
        ),
        compiler_params=pltpu.CompilerParams(
            dimension_semantics=("parallel", "parallel", "arbitrary"),
            vmem_limit_bytes=_VMEM_LIMIT,
        ),
    )(x, w, b)


# ----------------------------------------------------------------------------
# Kernel 2: flash-style scaled-dot-product attention (online softmax).
#   qkv is the fused projection [B, S, 3*H*d_k] with column layout
#   [q(h0..h_{H-1}) | k(h0..) | v(h0..)], each slice d_k (=128k) wide, so
#   per-head q/k/v tiles are read via lane-block index maps (no transpose).
#   Causal mask is built in-kernel from iota; fully-future KV tiles skipped.
# ----------------------------------------------------------------------------
def _flash_kernel(q_ref, k_ref, v_ref, o_ref, m_sc, l_sc, acc_sc,
                  *, tq, tkv, causal):
    qi = pl.program_id(2)
    kvi = pl.program_id(3)

    @pl.when(kvi == 0)
    def _():
        m_sc[...] = jnp.full_like(m_sc, -jnp.inf)
        l_sc[...] = jnp.zeros_like(l_sc)
        acc_sc[...] = jnp.zeros_like(acc_sc)

    def _update():
        q = q_ref[0]              # (tq, d_k)  bf16 (1/sqrt(d_k) folded into Wq)
        k = k_ref[0]              # (tkv, d_k) bf16
        v = v_ref[0]              # (tkv, d_k) bf16

        # q @ k^T without an in-kernel transpose: contract the last axes.
        s = lax.dot_general(q, k, (((1,), (1,)), ((), ())),
                            preferred_element_type=jnp.float32)
        if causal:
            q_pos = qi * tq + lax.broadcasted_iota(jnp.int32, (tq, tkv), 0)
            k_pos = kvi * tkv + lax.broadcasted_iota(jnp.int32, (tq, tkv), 1)
            s = jnp.where(k_pos <= q_pos, s, jnp.float32(_MASK_VALUE))

        m_prev = m_sc[...]
        m_new = jnp.maximum(m_prev, jnp.max(s, axis=-1, keepdims=True))
        alpha = jnp.exp(m_prev - m_new)
        p = jnp.exp(s - m_new)

        l_sc[...] = alpha * l_sc[...] + jnp.sum(p, axis=-1, keepdims=True)
        acc_sc[...] = alpha * acc_sc[...] + jnp.dot(
            p.astype(v.dtype), v, preferred_element_type=jnp.float32)
        m_sc[...] = m_new

    if causal:
        # Skip KV tiles that lie entirely in the future of every query row.
        pl.when(kvi * tkv <= qi * tq + (tq - 1))(_update)
    else:
        _update()

    @pl.when(kvi == pl.num_programs(3) - 1)
    def _():
        o_ref[0] = (acc_sc[...] *
                    pl.reciprocal(l_sc[...], approx=True)).astype(o_ref.dtype)


def flash_attention(qkv, *, heads, causal, tq=512, tkv=512):
    """qkv: [B, S, 3*H*d_k] fused projection.  Returns [B, S, H*d_k] with
    heads already merged in the standard (h, d_k) column layout."""
    B, S, three_d = qkv.shape
    d_k = three_d // (3 * heads)
    assert d_k % 128 == 0, "head dim must be lane-aligned (multiple of 128)"
    tq = _pick_tile(S, tq, 128)
    tkv = _pick_tile(S, tkv, 128)
    H = heads

    kern = functools.partial(_flash_kernel, tq=tq, tkv=tkv, causal=causal)
    return pl.pallas_call(
        kern,
        out_shape=jax.ShapeDtypeStruct((B, S, H * d_k), qkv.dtype),
        grid_spec=pltpu.PrefetchScalarGridSpec(
            num_scalar_prefetch=0,
            grid=(B, H, S // tq, S // tkv),
            in_specs=[
                pl.BlockSpec((1, tq, d_k),
                             lambda b, h, qi, kvi: (b, qi, h)),
                pl.BlockSpec((1, tkv, d_k),
                             lambda b, h, qi, kvi: (b, kvi, H + h)),
                pl.BlockSpec((1, tkv, d_k),
                             lambda b, h, qi, kvi: (b, kvi, 2 * H + h)),
            ],
            out_specs=pl.BlockSpec((1, tq, d_k),
                                   lambda b, h, qi, kvi: (b, qi, h)),
            scratch_shapes=[
                pltpu.VMEM((tq, 1), jnp.float32),     # running max
                pltpu.VMEM((tq, 1), jnp.float32),     # running denominator
                pltpu.VMEM((tq, d_k), jnp.float32),   # running numerator
            ],
        ),
        compiler_params=pltpu.CompilerParams(
            dimension_semantics=("parallel", "parallel", "parallel",
                                 "arbitrary"),
            vmem_limit_bytes=_VMEM_LIMIT,
        ),
    )(qkv, qkv, qkv)


# ----------------------------------------------------------------------------
# MultiHeadedAttention forward (all hot paths in Pallas; only free reshapes
# of activations in JAX — no activation transposes, no mask stream).
# ----------------------------------------------------------------------------
def multi_headed_attention(params, query, key, value, *, h, causal):
    """query/key/value: [B, S, D].  Only self-attention is kernelized;
    mask handling is the static `causal` flag (True = subsequent mask,
    False = all-ones mask)."""
    assert (query is key) and (query is value), "only self-attention kernelized"
    B, S, D = query.shape
    assert D % h == 0

    x = query.reshape(B * S, D)
    qkv = linear(x, params["wqkv"], params["bqkv"])              # [B*S, 3D]
    attn = flash_attention(qkv.reshape(B, S, 3 * D), heads=h, causal=causal)
    out = linear(attn.reshape(B * S, D), params["wo"], params["bo"])
    return out.reshape(B, S, D)


def make_params(base, *, h, dtype=jnp.bfloat16):
    """One-time re-layout of PyTorch-style [Din, Dout] weights:
    fuse Q/K/V, fold 1/sqrt(d_k) into Wq/bq, and cast matmul weights to
    bf16 (biases stay f32 and are added to the f32 accumulator)."""
    D = base["wq"].shape[0]
    d_k = D // h
    scale = 1.0 / math.sqrt(d_k)
    wqkv = jnp.concatenate([base["wq"] * scale, base["wk"], base["wv"]],
                           axis=1).astype(dtype)                  # [D, 3D]
    bqkv = jnp.concatenate([base["bq"] * scale, base["bk"], base["bv"]],
                           axis=1).astype(jnp.float32)            # [1, 3D]
    return dict(wqkv=wqkv, bqkv=bqkv,
                wo=base["wo"].astype(dtype),
                bo=base["bo"].astype(jnp.float32))


# ----------------------------------------------------------------------------
# Pure-JAX reference (mirrors the PyTorch module, eval-mode dropout)
# ----------------------------------------------------------------------------
def reference(base, x, *, h, causal):
    B, S, D = x.shape
    d_k = D // h
    xf = x.astype(jnp.float32).reshape(B * S, D)

    def proj(w, b):
        y = xf @ w + b
        return y.reshape(B, S, h, d_k).transpose(0, 2, 1, 3)

    q = proj(base["wq"], base["bq"])
    k = proj(base["wk"], base["bk"])
    v = proj(base["wv"], base["bv"])

    scores = jnp.einsum("bhqd,bhkd->bhqk", q, k) / math.sqrt(d_k)
    if causal:
        cm = jnp.tril(jnp.ones((S, S), jnp.float32))
        scores = jnp.where(cm[None, None] == 0, _MASK_VALUE, scores)
    p = jax.nn.softmax(scores, axis=-1)
    y = jnp.einsum("bhqk,bhkd->bhqd", p, v)
    y = y.transpose(0, 2, 1, 3).reshape(B * S, D)
    return (y @ base["wo"] + base["bo"]).reshape(B, S, D)


if __name__ == "__main__":
    # d_model=256, 2 heads -> d_k=128 (lane-aligned); seq=1024 so both flash
    # grid axes take >1 step and the causal KV-tile skip is exercised.
    B, S, D, H = 2, 1024, 256, 2

    key0 = jax.random.PRNGKey(0)
    ks = jax.random.split(key0, 9)

    def init_linear(kw, kb, din, dout):
        bound = 1.0 / math.sqrt(din)
        w = jax.random.uniform(kw, (din, dout), jnp.float32, -bound, bound)
        b = jax.random.uniform(kb, (1, dout), jnp.float32, -bound, bound)
        return w, b

    wq, bq = init_linear(ks[0], ks[1], D, D)
    wk, bk = init_linear(ks[2], ks[3], D, D)
    wv, bv = init_linear(ks[4], ks[5], D, D)
    wo, bo = init_linear(ks[6], ks[7], D, D)
    base = dict(wq=wq, bq=bq, wk=wk, bk=bk, wv=wv, bv=bv, wo=wo, bo=bo)
    params = make_params(base, h=H)

    x = jax.random.normal(ks[8], (B, S, D), jnp.float32).astype(jnp.bfloat16)

    # Decoder-style causal self-attention (subsequent mask).
    out_c = multi_headed_attention(params, x, x, x, h=H, causal=True)
    out_c = jax.block_until_ready(out_c)
    ref_c = reference(base, x, h=H, causal=True)
    err_c = float(jnp.max(jnp.abs(out_c.astype(jnp.float32) - ref_c)))
    assert jnp.allclose(out_c.astype(jnp.float32), ref_c,
                        atol=5e-2, rtol=5e-2), err_c

    # Encoder-style self-attention (src_mask == all-ones -> no masking).
    out_e = multi_headed_attention(params, x, x, x, h=H, causal=False)
    out_e = jax.block_until_ready(out_e)
    ref_e = reference(base, x, h=H, causal=False)
    err_e = float(jnp.max(jnp.abs(out_e.astype(jnp.float32) - ref_e)))
    assert jnp.allclose(out_e.astype(jnp.float32), ref_e,
                        atol=5e-2, rtol=5e-2), err_e

    print("KERNEL_OK")
</pallas_src>

<mosaic_0001>
module attributes {stable_mosaic.version = 11 : i64} {
  func.func @_linear_kernel(%arg0: i32, %arg1: i32, %arg2: i32, %arg3: memref<512x256xbf16, #tpu.memory_space<vmem>>, %arg4: memref<256x384xbf16, #tpu.memory_space<vmem>>, %arg5: memref<1x384xf32, #tpu.memory_space<vmem>>, %arg6: memref<512x384xbf16, #tpu.memory_space<vmem>>, %arg7: memref<512x384xf32, #tpu.memory_space<vmem>>) attributes {dimension_semantics = [#tpu.dimension_semantics<parallel>, #tpu.dimension_semantics<parallel>, #tpu.dimension_semantics<arbitrary>], iteration_bounds = array<i64: 4, 2, 1>, scalar_prefetch = 0 : i64, scratch_operands = 1 : i64, tpu.core_type = #tpu.core_type<tc>, window_params = [{transform_indices = @transform_0, window_bounds = array<i64: 512, 256>}, {transform_indices = @transform_1, window_bounds = array<i64: 256, 384>}, {transform_indices = @transform_2, window_bounds = array<i64: 1, 384>}, {transform_indices = @transform_3, window_bounds = array<i64: 512, 384>}]} {
    %c0_i32 = arith.constant 0 : i32
    %0 = arith.cmpi eq, %arg2, %c0_i32 : i32
    %1 = arith.extui %0 : i1 to i32
    %c0_i32_0 = arith.constant 0 : i32
    %2 = arith.cmpi ne, %1, %c0_i32_0 : i32
    scf.if %2 {
      %cst_10 = arith.constant 0.000000e+00 : f32
      %12 = vector.broadcast %cst_10 : f32 to vector<512x384xf32>
      %c0_11 = arith.constant 0 : index
      %c0_12 = arith.constant 0 : index
      %13 = vector.load %arg7[%c0_11, %c0_12] : memref<512x384xf32, #tpu.memory_space<vmem>>, vector<512x384xf32>
      tpu.vector_store %arg7[%c0_11, %c0_12], %12 {strides = array<i32>} : memref<512x384xf32, #tpu.memory_space<vmem>>, vector<512x384xf32>,
    } else {
    }
    %c0 = arith.constant 0 : index
    %c0_1 = arith.constant 0 : index
    %3 = vector.load %arg7[%c0, %c0_1] : memref<512x384xf32, #tpu.memory_space<vmem>>, vector<512x384xf32>
    %c0_2 = arith.constant 0 : index
    %c0_3 = arith.constant 0 : index
    %4 = vector.load %arg3[%c0_2, %c0_3] : memref<512x256xbf16, #tpu.memory_space<vmem>>, vector<512x256xbf16>
    %c0_4 = arith.constant 0 : index
    %c0_5 = arith.constant 0 : index
    %5 = vector.load %arg4[%c0_4, %c0_5] : memref<256x384xbf16, #tpu.memory_space<vmem>>, vector<256x384xbf16>
    %cst = arith.constant dense<0.000000e+00> : vector<512x384xf32>
    %6 = tpu.matmul %4, %5, %cst {dimension_numbers = #tpu.dot_dimension_numbers<[1], [0], [0], [1], [0, 0, 1, 1], [], []>} : vector<512x256xbf16>, vector<256x384xbf16>, vector<512x384xf32> -> vector<512x384xf32>
    %7 = arith.addf %3, %6 : vector<512x384xf32>
    %c0_6 = arith.constant 0 : index
    %c0_7 = arith.constant 0 : index
    %8 = vector.load %arg7[%c0_6, %c0_7] : memref<512x384xf32, #tpu.memory_space<vmem>>, vector<512x384xf32>
    tpu.vector_store %arg7[%c0_6, %c0_7], %7 {strides = array<i32>} : memref<512x384xf32, #tpu.memory_space<vmem>>, vector<512x384xf32>,
    %c0_i32_8 = arith.constant 0 : i32
    %9 = arith.cmpi eq, %arg2, %c0_i32_8 : i32
    %10 = arith.extui %9 : i1 to i32
    %c0_i32_9 = arith.constant 0 : i32
    %11 = arith.cmpi ne, %10, %c0_i32_9 : i32
    scf.if %11 {
      %c0_10 = arith.constant 0 : index
      %c0_11 = arith.constant 0 : index
      %12 = vector.load %arg7[%c0_10, %c0_11] : memref<512x384xf32, #tpu.memory_space<vmem>>, vector<512x384xf32>
      %c0_12 = arith.constant 0 : index
      %c0_13 = arith.constant 0 : index
      %13 = vector.load %arg5[%c0_12, %c0_13] : memref<1x384xf32, #tpu.memory_space<vmem>>, vector<1x384xf32>
      %14 = vector.broadcast %13 : vector<1x384xf32> to vector<512x384xf32>
      %15 = arith.addf %12, %14 : vector<512x384xf32>
      %16 = arith.truncf %15 : vector<512x384xf32> to vector<512x384xbf16>
      %c0_14 = arith.constant 0 : index
      %c0_15 = arith.constant 0 : index
      %17 = vector.load %arg6[%c0_14, %c0_15] : memref<512x384xbf16, #tpu.memory_space<vmem>>, vector<512x384xbf16>
      tpu.vector_store %arg6[%c0_14, %c0_15], %16 {strides = array<i32>} : memref<512x384xbf16, #tpu.memory_space<vmem>>, vector<512x384xbf16>,
    } else {
    }
    return
  }
  func.func @transform_0(%arg0: i32, %arg1: i32, %arg2: i32) -> (i32, i32) {
    %c0_i32 = arith.constant 0 : i32
    return %arg0, %arg2 : i32, i32
  }
  func.func @transform_1(%arg0: i32, %arg1: i32, %arg2: i32) -> (i32, i32) {
    %c0_i32 = arith.constant 0 : i32
    return %arg2, %arg1 : i32, i32
  }
  func.func @transform_2(%arg0: i32, %arg1: i32, %arg2: i32) -> (i32, i32) {
    %c0_i32 = arith.constant 0 : i32
    %c0_i32_0 = arith.constant 0 : i32
    return %c0_i32, %arg1 : i32, i32
  }
  func.func @transform_3(%arg0: i32, %arg1: i32, %arg2: i32) -> (i32, i32) {
    %c0_i32 = arith.constant 0 : i32
    return %arg0, %arg1 : i32, i32
  }
}

</mosaic_0001>

<bundles_post_ra>
// kernel: tpu_custom_call.1
= control target key start
LH: loop header
LB: loop body
LE: loop exit
PB: predicated region body
PF: predicated region fallthrough
CT: control target
= control target key end

     0   :  { %s5488_s0 = inlined_call_operand.hbm [shape: bf16[2048,256], index: 0, kind: input, shape index: {}]   ;;  %s5489_s1 = inlined_call_operand.hbm [shape: bf16[256,768], index: 1, kind: input, shape index: {}]   ;;  %s5490_s2 = inlined_call_operand.hbm [shape: f32[1,768], index: 2, kind: input, shape index: {}]   ;;  %s5491_s3 = inlined_call_operand.hbm [shape: bf16[2048,768], index: 3, kind: output, shape index: {}]  }
   0x1   :  { %5502 = sst [smem:[#allocation25_spill]] %s5488_s0 }
   0x2   :  { %5503 = sst [smem:[#allocation26_spill]] %s5489_s1 }
   0x3   :  { %5504 = sst [smem:[#allocation27_spill]] %s5491_s3 }
   0x4   :  { %8 = vsyncpa [#allocation4], 0 }
   0x5   :  { %10 = vsyncpa [#allocation4 + $0x1], 0 }
   0x6   :  { %11 = vsyncpa [#allocation7], 0 }
   0x7   :  { %13 = vsyncpa [#allocation7 + $0x1], 0 }
   0x8   :  { %14 = vsyncpa [#allocation5], 0 }
   0x9   :  { %16 = vsyncpa [#allocation5 + $0x1], 0  ;;  %s4716_s12 = smov 0   ;;  %s4718_s13 = smov 0  }
   0xa   :  { %s4720_s14 = smov 0   ;;  %s4722_s15 = smov 0  }
   0xb   :  { %s4724_s16 = smov 0   ;;  %s4726_s17 = smov 0  }
   0xc   :  { %s4728_s18 = smov 0   ;;  %s4730_s19 = smov 0  }
   0xd   :  { %s4732_s20 = smov 0   ;;  %s4734_s21 = smov 0  }
   0xe   :  { %s4736_s22 = smov 0   ;;  %s4738_s23 = smov 0  }
   0xf   :  { %s4740_s24 = smov 0   ;;  %s4742_s25 = smov 0  }
  0x10 LB: > { %5505 = sst [smem:[#allocation13_spill]] %s4629_s12  ;;  %p58_p0 = scmp.eq.s32.totalorder %s4681_s25, 0  ;;  %s4681_s25 = sphi %s4742_s25, %s22_s25   ;;  %s4677_s24 = sphi %s4740_s24, %s5546_s24   ;;  %s4673_s23 = sphi %s4738_s23, %s5545_s23   ;;  %s4669_s22 = sphi %s4736_s22, %s5544_s22   ;;  %s4665_s21 = sphi %s4734_s21, %s5554_s21   ;;  %s4661_s20 = sphi %s4732_s20, %s5542_s20   ;;  %s4657_s19 = sphi %s4730_s19, %s5553_s19   ;;  %s4653_s18 = sphi %s4728_s18, %s5552_s18   ;;  %s4649_s17 = sphi %s4726_s17, %s5551_s17   ;;  %s4645_s16 = sphi %s4724_s16, %s5550_s16   ;;  %s4641_s15 = sphi %s4722_s15, %s5549_s15   ;;  %s4637_s14 = sphi %s4720_s14, %s5539_s14   ;;  %s4633_s13 = sphi %s4718_s13, %s5548_s13   ;;  %s4629_s12 = sphi %s4716_s12, %s5547_s12  }
  0x11   : > { %5506 = sst [smem:[#allocation14_spill]] %s4637_s14  ;;  %p85_p1 = scmp.ne.s32.totalorder %s4649_s17, %s4645_s16 }
  0x12   : > { %5507 = sst [smem:[#allocation15_spill]] %s4661_s20  ;;  %p91_p2 = scmp.ne.s32.totalorder %s4645_s16, %s4641_s15 }
  0x13   : > { %5508 = sst [smem:[#allocation16_spill]] %s4665_s21  ;;  %p87_p3 = por %p85_p1, %p58_p0 }
  0x14   : > { %5509 = sst [smem:[#allocation17_spill]] %s4669_s22  ;;  %p4166_p4 = scmp.lt.s32.totalorder %s4681_s25, 8 }
  0x15   : > { %5510 = sst [smem:[#allocation18_spill]] %s4673_s23  ;;  %s193_s28 = sand.u32 1, %s4681_s25  }
  0x16   : > { %5511 = sst [smem:[#allocation19_spill]] %s4677_s24  ;;  %s5492_s29 = sand.u32 1, %s4649_s17  }
  0x17   : > { %s4138_s30 = smul.u32 384, %s5492_s29  ;;  %p4803_p5 = pnand %p4166_p4, %p87_p3 }
  0x18   : > { %s4008_s4 = smul.u32 192, %s4673_s23  ;;  %s5513_s1 = sld [smem:[#allocation26_spill]] }
  0x19   : > { %s197_s9 = scalar_lea.vmem [#allocation6], %s4138_s30  ;;  %s4810_s11 = scalar_lea.sflag [#allocation7], %s193_s28 }
  0x1a   : > { %s207_s10 = sshll.u32 %s197_s9, 4  ;;  %p5496_p6 = pneg %p4803_p5  ;;  %s208_s10 = int_to_ptr.vmem [resolvable:$true] %s207_s10 }
  0x1b   : > { %s4462_s29 = scalar_lea.vmem %s208_s10, 6144  ;;  %s4683_s27 = smov [#allocation6]  }
  0x1c   : > { %p4463_p7 = scmp.ne.s32.totalorder %s208_s10, %s4462_s29  ;;  %s4467_s26 = sshll.u32 %s4683_s27, 4  ;;  %s4468_s26 = int_to_ptr.vmem [resolvable:$false] %s4467_s26 }
  0x1d   : > { %s4469_s6 = scalar_lea.vmem %s4468_s26, 12288  ;;  %p4470_p10 = scmp.lt.s32.totalorder %s208_s10, %s4468_s26 }
  0x1e   : > { %s206_s8 = scalar_lea.hbm %s5513_s1, %s4008_s4  ;;  %p4465_p8 = pnand %p4463_p7, %p5496_p6 }
  0x1f   : > { %p4471_p11 = scmp.lt.s32.totalorder %s4469_s6, %s4462_s29 }
  0x20   : > { %p4466_p9 = pneg %p4465_p8 }
  0x21   : > { %p4472_p12 = por %p4471_p11, %p4470_p10 }
  0x23   : > { %p4473_p13 = pnand %p4472_p12, %p4466_p9 }
  0x25   : > { %4476 = shalt.err (!%p4473_p13)
}
  0x26   : > { %s4684_s30 = smov 384   ;;  %s4685_s26 = smov 192  }
  0x27   : > { %s4686_s27 = smov 12   ;;  %p3759_p1 = scmp.ge.s32.totalorder %s4681_s25, 1 }
  0x28   : > { %4158 = dma.hbm_to_vmem [thread:$0]  (!%p4803_p5), %s206_s8, 6144, %s208_s10, %s4810_s11, %s4684_s30, %s4685_s26, %s4686_s27  }
  0x29   : > { %p234_p3 = scmp.lt.s32.totalorder %s4681_s25, 9  ;;  %s4827_s29 = sadd.s32 4294967295, %s4681_s25  }
  0x2a   : > { %s3750_s4 = sadd.s32 4294967294, %s4681_s25   ;;  %s5515_s7 = sadd.s32 1, %s4673_s23 }
  0x2b   : > { %p4822_p7 = pnand %p3759_p1, %p234_p3  ;;  %p39_p8 = scmp.ge.s32.totalorder %s5515_s7, 2 }
  0x2c   : > { %s41_s9 = sadd.s32 1, %s4677_s24  ;;  %s50_s6 = sadd.s32 1, %s4661_s20 }
  0x2d   : > { %s5516_s1 = smov %s5515_s7  ;;  %s5558_s9 = smov (!%p39_p8, %s41_s9), %s4677_s24 }
  0x2e   : > { %s5556_s1 = smov (%p39_p8, %s5516_s1), 0  ;;  %p57_p9 = scmp.ne.s32.totalorder %s4661_s20, %s4657_s19 }
  0x2f   : > { %5517 = sst [smem:[#allocation20_spill]] %s5556_s1  ;;  %p63_p10 = scmp.ne.s32.totalorder %s4657_s19, %s4653_s18 }
  0x30   : > { %p43_p11 = scmp.ge.s32.totalorder %s5558_s9, 4  ;;  %p64_p12 = scmp.eq.s32.totalorder %s4827_s29, 0 }
  0x31   : > { %p4846_p13 = por %p58_p0, %p57_p9  ;;  %s74_s10 = ssub.s32 %s4673_s23, %s5556_s1 }
  0x32   : > { %s5560_s9 = smov (%p43_p11, %s5558_s9), 0  ;;  %p4854_p1 = por %p64_p12, %p63_p10 }
  0x33   : > { %5519 = sst [smem:[#allocation21_spill]] %s5560_s9  ;;  %p76_p3 = scmp.eq.s32.totalorder %s74_s10, 0 }
  0x34   : > { %s45_s18 = ssub.s32 %s4677_s24, %s5560_s9  ;;  %p4863_p8 = por %p91_p2, %p64_p12 }
  0x35   : > { %p48_p0 = scmp.eq.s32.totalorder %s45_s18, 0  ;;  %s129_s27 = sor.u32 %s74_s10, %s45_s18 }
  0x36   : > { %s5522_s7 = sadd.s32 1, %s4649_s17  ;;  %p130_p9 = scmp.eq.s32.totalorder %s129_s27, 0 }
  0x37   : > { %s4870_s1 = scalar_select %p76_p3, %s4649_s17, %s5522_s7  }
  0x38   : > { %s4873_s3 = scalar_select %p48_p0, %s4661_s20, %s50_s6  }
  0x39   : > { %5523 = sst [smem:[#allocation22_spill]] %s4870_s1  ;;  %s132_s22 = sadd.s32 1, %s4637_s14 }
  0x3a   : > { %5524 = sst [smem:[#allocation23_spill]] %s4873_s3  ;;  %p142_p10 = scmp.ne.s32.totalorder %s4637_s14, %s4633_s13 }
  0x3b   : > { %p143_p11 = scmp.eq.s32.totalorder %s4827_s29, 7  ;;  %p148_p12 = scmp.ne.s32.totalorder %s4633_s13, %s4629_s12 }
  0x3c   : > { %s4880_s15 = scalar_select %p130_p9, %s4637_s14, %s132_s22  }
  0x3d   : > { %p4882_p2 = por %p143_p11, %p142_p10  ;;  %p149_p6 = scmp.eq.s32.totalorder %s3750_s4, 7 }
  0x3e   : > { %5525 = sst [smem:[#allocation24_spill]] %s4880_s15  ;;  %s169_s10 = sand.u32 1, %s4661_s20  }
  0x3f   : > { %s3753_s18 = sshll.u32 %s169_s10, 9  ;;  %p4889_p3 = por %p149_p6, %p148_p12 }
  0x40   : > { %s4007_s27 = sshll.u32 %s4677_s24, 13  ;;  %s173_s7 = scalar_lea.vmem [#allocation3], %s3753_s18 }
  0x41   : > { %s5527_s6 = scalar_select %p4889_p3, 1, 0 }
  0x42   : > { %s183_s3 = sshll.u32 %s173_s7, 4  ;;  %s5528_s0 = sld [smem:[#allocation25_spill]]  ;;  %s184_s3 = int_to_ptr.vmem [resolvable:$true] %s183_s3 }
  0x43   : > { %p4901_p0 = pnand %p4166_p4, %p4846_p13  ;;  %s5530_s4 = sand.u32 1, %s4649_s17  }
  0x44   : > { %s4139_s20 = smul.u32 3, %s5530_s4  ;;  %s170_s12 = scalar_lea.sflag [#allocation4], %s169_s10 }
  0x45   : > { %s4009_s14 = smul.u32 48, %s4673_s23  ;;  %p4479_p6 = pneg %p4901_p0 }
  0x46   : > { %s4490_s18 = scalar_lea.vmem %s184_s3, 8192  ;;  %s4687_s1 = smov [#allocation3]  }
  0x47   : > { %p4491_p9 = scmp.ne.s32.totalorder %s184_s3, %s4490_s18  ;;  %s4495_s21 = sshll.u32 %s4687_s1, 4  ;;  %s4496_s21 = int_to_ptr.vmem [resolvable:$false] %s4495_s21 }
  0x48   : > { %s182_s22 = scalar_lea.hbm %s5528_s0, %s4007_s27  ;;  %s4497_s8 = scalar_lea.vmem %s4496_s21, 16384 }
  0x49   : > { %p4493_p10 = pnand %p4491_p9, %p4479_p6  ;;  %p4498_p12 = scmp.lt.s32.totalorder %s184_s3, %s4496_s21 }
  0x4a   : > { %p4499_p4 = scmp.lt.s32.totalorder %s4497_s8, %s4490_s18 }
  0x4b   : > { %p4494_p11 = pneg %p4493_p10 }
  0x4c   : > { %p4500_p13 = por %p4499_p4, %p4498_p12 }
  0x4e   : > { %p4501_p3 = pnand %p4500_p13, %p4494_p11 }
  0x50   : > { %4504 = shalt.err (!%p4501_p3)
}
  0x51   : > { %s4688_s27 = smov 128   ;;  %s4689_s7 = smov 8  }
  0x52   : > { %4155 = dma.hbm_to_vmem [thread:$0]  (!%p4901_p0), %s182_s22, 8192, %s184_s3, %s170_s12, %s4688_s27, %s4688_s27, %s4689_s7  }
  0x53   : > { %s227_s0 = scalar_lea.hbm %s5490_s2, %s4009_s14  ;;  %s221_s24 = scalar_lea.vmem [#allocation8], %s4139_s20 }
  0x54   : > { %s229_s23 = sshll.u32 %s221_s24, 4  ;;  %p5531_p9 = pneg %p4803_p5  ;;  %s230_s23 = int_to_ptr.vmem [resolvable:$true] %s229_s23 }
  0x55   : > { %s4518_s1 = scalar_lea.vmem %s230_s23, 48  ;;  %s4690_s18 = smov [#allocation8]  }
  0x56   : > { %p4519_p6 = scmp.ne.s32.totalorder %s230_s23, %s4518_s1  ;;  %s4523_s21 = sshll.u32 %s4690_s18, 4  ;;  %s4524_s21 = int_to_ptr.vmem [resolvable:$false] %s4523_s21 }
  0x57   : > { %s4525_s8 = scalar_lea.vmem %s4524_s21, 96  ;;  %p4526_p3 = scmp.lt.s32.totalorder %s230_s23, %s4524_s21 }
  0x58   : > { %p4521_p10 = pnand %p4519_p6, %p5531_p9  ;;  %p4527_p12 = scmp.lt.s32.totalorder %s4525_s8, %s4518_s1 }
  0x5a   : > { %p4522_p11 = pneg %p4521_p10  ;;  %p4528_p0 = por %p4527_p12, %p4526_p3 }
  0x5c   : > { %p4529_p4 = pnand %p4528_p0, %p4522_p11 }
  0x5e   : > { %4532 = shalt.err (!%p4529_p4)
}
  0x5f   : > { %4161 = dma.hbm_to_vmem [thread:$0]  (!%p4803_p5), %s227_s0, 48, %s230_s23, %s4810_s11  }
  0x60   : > { %238 = sbr.rel (%p4822_p7) target bundleno = 638 (0x27e), region = 32  ;;  %s240_s3 = sand.u32 (!%p4822_p7), 1, %s4657_s19  }
  0x61   : > { %s3760_s12 = sshll.u32 (!%p4822_p7), %s240_s3, 9  ;;  %s241_s14 = scalar_lea.sflag (!%p4822_p7), [#allocation4], %s240_s3 }
  0x62   : > { %s4924_s20 = scalar_lea.vmem (!%p4822_p7), [#allocation3], %s3760_s12 }
  0x65   : > { %4616 = dma.done.wait (%p4854_p1), %s241_s14, 8192  }
  0x66   : > { %4618 = vsyncadd (%p4854_p1), %s241_s14, 4294959104  ;;  %s249_s0 = sand.u32 1, %s4827_s29   ;;  %s251_s23 = sand.u32 1, %s4645_s16  }
  0x67   : > { %s4140_s24 = smul.u32 384, %s251_s23  ;;  %s250_s5 = scalar_lea.sflag [#allocation7], %s249_s0 }
  0x69   : > { %s4934_s11 = scalar_lea.vmem [#allocation6], %s4140_s24 }
  0x6a   : > { %4620 = dma.done.wait (%p4863_p8), %s250_s5, 6192  }
  0x6b   : > { %4622 = vsyncadd (%p4863_p8), %s250_s5, 4294961104  ;;  %v4691_v0 = vmov 0   ;;  %v4289_v1 = vld [vmem:[%s4934_s11 + $0xac] ss:$12 sps:$4 sm:$0xff]   ;;  %v4291_v2 = vld [vmem:[%s4934_s11 + $0xb0] ss:$12 sps:$4 sm:$0xff]  }
  0x6c   : > { %1748 = vmatprep.subr.bf16.mxu1 %v4691_v0  ;;  %1395 = vmatprep.subr.bf16.mxu0 %v4289_v1  ;;  %v4292_v3 = vld [vmem:[%s4934_s11 + $0xa8] ss:$12 sps:$4 sm:$0xff]   ;;  %v4295_v5 = vld [vmem:[%s4934_s11 + $0x98] ss:$12 sps:$4 sm:$0xff]   ;;  %v4296_v6 = vld [vmem:[%s4934_s11 + $0x90] ss:$12 sps:$4 sm:$0xff]  }
  0x6d   : > { %1749 = vmatpush1.bf16.msra.mxu1 %v4291_v2  ;;  %v4293_v4 = vld [vmem:[%s4934_s11 + $0x94] ss:$12 sps:$4 sm:$0xff]   ;;  %1396 = vmatpush1.bf16.msra.mxu0 %v4292_v3  ;;  %v4297_v7 = vld [vmem:[%s4934_s11 + $0x7c] ss:$12 sps:$4 sm:$0xff]   ;;  %v4300_v9 = vld [vmem:[%s4934_s11 + $0x78] ss:$12 sps:$4 sm:$0xff]  }
  0x6e   : > { %1750 = vmatprep.subr.bf16.mxu1 %v4691_v0  ;;  %1397 = vmatprep.subr.bf16.mxu0 %v4293_v4  ;;  %v4299_v8 = vld [vmem:[%s4934_s11 + $0x80] ss:$12 sps:$4 sm:$0xff]   ;;  %v4301_v10 = vld [vmem:[%s4934_s11 + $0x64] ss:$12 sps:$4 sm:$0xff]   ;;  %v4303_v11 = vld [vmem:[%s4934_s11 + $0x68] ss:$12 sps:$4 sm:$0xff]  }
  0x6f   : > { %v4304_v12 = vld [vmem:[%s4934_s11 + $0x60] ss:$12 sps:$4 sm:$0xff]   ;;  %v4307_v14 = vld [vmem:[%s4934_s11 + $0x50] ss:$12 sps:$4 sm:$0xff]   ;;  %v4308_v15 = vld [vmem:[%s4934_s11 + $0x48] ss:$12 sps:$4 sm:$0xff]  }
  0x70   : > { %v4305_v13 = vld [vmem:[%s4934_s11 + $0x4c] ss:$12 sps:$4 sm:$0xff]   ;;  %v4309_v16 = vld [vmem:[%s4934_s11 + $0x34] ss:$12 sps:$4 sm:$0xff]   ;;  %v4312_v18 = vld [vmem:[%s4934_s11 + $0x30] ss:$12 sps:$4 sm:$0xff]  }
  0x71   : > { %1751 = vmatpush1.bf16.msra.mxu1 %v4295_v5  ;;  %1398 = vmatpush1.bf16.msra.mxu0 %v4296_v6  ;;  %v4311_v17 = vld [vmem:[%s4934_s11 + $0x38] ss:$12 sps:$4 sm:$0xff]   ;;  %v4313_v19 = vld [vmem:[%s4934_s11 + $0x1c] ss:$12 sps:$4 sm:$0xff]   ;;  %v4315_v20 = vld [vmem:[%s4934_s11 + $0x20] ss:$12 sps:$4 sm:$0xff]  }
  0x72   : > { %1752 = vmatprep.subr.bf16.mxu1 %v4691_v0  ;;  %1399 = vmatprep.subr.bf16.mxu0 %v4297_v7  ;;  %v4316_v21 = vld [vmem:[%s4934_s11 + $0x18] ss:$12 sps:$4 sm:$0xff]   ;;  %v4319_v23 = vld [vmem:[%s4934_s11 + $0x8] ss:$12 sps:$4 sm:$0xff]   ;;  %v4320_v24 = vld [vmem:[%s4934_s11] ss:$12 sps:$4 sm:$0xff]  }
  0x73   : > { %v4317_v22 = vld [vmem:[%s4934_s11 + $0x4] ss:$12 sps:$4 sm:$0xff]   ;;  %v4321_v25 = vld [vmem:[%s4934_s11 + $0x16c] ss:$12 sps:$4 sm:$0xff]   ;;  %v4324_v27 = vld [vmem:[%s4934_s11 + $0x168] ss:$12 sps:$4 sm:$0xff]  }
  0x74   : > { %v4323_v26 = vld [vmem:[%s4934_s11 + $0x170] ss:$12 sps:$4 sm:$0xff]   ;;  %v4325_v28 = vld [vmem:[%s4934_s11 + $0x154] ss:$12 sps:$4 sm:$0xff]   ;;  %v4327_v29 = vld [vmem:[%s4934_s11 + $0x158] ss:$12 sps:$4 sm:$0xff]  }
  0x75   : > { %1753 = vmatpush1.bf16.msra.mxu1 %v4299_v8  ;;  %1400 = vmatpush1.bf16.msra.mxu0 %v4300_v9  ;;  %v4328_v30 = vld [vmem:[%s4934_s11 + $0x150] ss:$12 sps:$4 sm:$0xff]   ;;  %v4355_v32 = vld [vmem:[%s4924_s20 + $0x4] ss:$8 sps:$4 sm:$0xff]   ;;  %v4335_v36 = vld [vmem:[%s4934_s11 + $0x128] ss:$12 sps:$4 sm:$0xff]  }
  0x76   : > { %1754 = vmatprep.subr.bf16.mxu1 %v4691_v0  ;;  %1401 = vmatprep.subr.bf16.mxu0 %v4301_v10  ;;  %v4329_v31 = vld [vmem:[%s4934_s11 + $0x13c] ss:$12 sps:$4 sm:$0xff]   ;;  %v4331_v33 = vld [vmem:[%s4934_s11 + $0x140] ss:$12 sps:$4 sm:$0xff]   ;;  %v4332_v34 = vld [vmem:[%s4934_s11 + $0x138] ss:$12 sps:$4 sm:$0xff]  }
  0x77   : > { %v4333_v35 = vld [vmem:[%s4934_s11 + $0x124] ss:$12 sps:$4 sm:$0xff]   ;;  %1780 = vmatprep.mubr.bf16.mxu1 %v4355_v32  ;;  %1427 = vmatprep.mubr.bf16.mxu0 %v4355_v32  ;;  %v4336_v37 = vld [vmem:[%s4934_s11 + $0x120] ss:$12 sps:$4 sm:$0xff]   ;;  %v4340_v40 = vld [vmem:[%s4934_s11 + $0x108] ss:$12 sps:$4 sm:$0xff]   ;;  %v2618_v32 = vlaneseq }
  0x78   : > { %v4337_v38 = vld [vmem:[%s4934_s11 + $0x10c] ss:$12 sps:$4 sm:$0xff]   ;;  %v4339_v39 = vld [vmem:[%s4934_s11 + $0x110] ss:$12 sps:$4 sm:$0xff]   ;;  %v4341_v41 = vld [vmem:[%s4934_s11 + $0xf4] ss:$12 sps:$4 sm:$0xff]  }
  0x79   : > { %1755 = vmatpush1.bf16.msra.mxu1 %v4303_v11  ;;  %1402 = vmatpush1.bf16.msra.mxu0 %v4304_v12  ;;  %v4343_v42 = vld [vmem:[%s4934_s11 + $0xf8] ss:$12 sps:$4 sm:$0xff]   ;;  %v4344_v43 = vld [vmem:[%s4934_s11 + $0xf0] ss:$12 sps:$4 sm:$0xff]   ;;  %v4347_v45 = vld [vmem:[%s4934_s11 + $0xe0] ss:$12 sps:$4 sm:$0xff]  }
  0x7a   : > { %1756 = vmatprep.subr.bf16.mxu1 %v4691_v0  ;;  %1403 = vmatprep.subr.bf16.mxu0 %v4305_v13  ;;  %v4345_v44 = vld [vmem:[%s4934_s11 + $0xdc] ss:$12 sps:$4 sm:$0xff]   ;;  %v4348_v46 = vld [vmem:[%s4934_s11 + $0xd8] ss:$12 sps:$4 sm:$0xff]   ;;  %v4352_v49 = vld [vmem:[%s4934_s11 + $0xc0] ss:$12 sps:$4 sm:$0xff]  }
  0x7b   : > { %v4349_v47 = vld [vmem:[%s4934_s11 + $0xc4] ss:$12 sps:$4 sm:$0xff]   ;;  %v4351_v48 = vld [vmem:[%s4934_s11 + $0xc8] ss:$12 sps:$4 sm:$0xff]   ;;  %s4141_s28 = smul.u32 3, %s251_s23  ;;  %s292_s29 = sand.u32 1, %s4633_s13  }
  0x7c   : > { %v4353_v50 = vld [vmem:[%s4924_s20] ss:$8 sps:$4 sm:$0xff]   ;;  %v4356_v51 = vld [vmem:[%s4924_s20 + $0x14] ss:$8 sps:$4 sm:$0xff]   ;;  %v4358_v52 = vld [vmem:[%s4924_s20 + $0x10] ss:$8 sps:$4 sm:$0xff]  }
  0x7d   : > { %1757 = vmatpush1.bf16.msra.mxu1 %v4307_v14  ;;  %1404 = vmatpush1.bf16.msra.mxu0 %v4308_v15  ;;  %v4359_v53 = vld [vmem:[%s4924_s20 + $0x24] ss:$8 sps:$4 sm:$0xff]   ;;  %v4361_v54 = vld [vmem:[%s4924_s20 + $0x20] ss:$8 sps:$4 sm:$0xff]   ;;  %v4362_v55 = vld [vmem:[%s4924_s20 + $0x34] ss:$8 sps:$4 sm:$0xff]  }
  0x7e   : > { %1758 = vmatprep.subr.bf16.mxu1 %v4691_v0  ;;  %1405 = vmatprep.subr.bf16.mxu0 %v4309_v16  ;;  %v4364_v56 = vld [vmem:[%s4924_s20 + $0x30] ss:$8 sps:$4 sm:$0xff]   ;;  %v4365_v57 = vld [vmem:[%s4924_s20 + $0x44] ss:$8 sps:$4 sm:$0xff]   ;;  %v4367_v58 = vld [vmem:[%s4924_s20 + $0x40] ss:$8 sps:$4 sm:$0xff]  }
  0x7f   : > { %v4368_v59 = vld [vmem:[%s4924_s20 + $0x54] ss:$8 sps:$4 sm:$0xff]   ;;  %v4370_v60 = vld [vmem:[%s4924_s20 + $0x50] ss:$8 sps:$4 sm:$0xff]   ;;  %v4371_v61 = vld [vmem:[%s4924_s20 + $0x64] ss:$8 sps:$4 sm:$0xff]  }
  0x80   : > { %v4373_v62 = vld [vmem:[%s4924_s20 + $0x60] ss:$8 sps:$4 sm:$0xff]   ;;  %v4374_v63 = vld [vmem:[%s4924_s20 + $0x74] ss:$8 sps:$4 sm:$0xff]   ;;  %v4377_v1 = vld [vmem:[%s4924_s20 + $0x84] ss:$8 sps:$4 sm:$0xff]  }
  0x81   : > { %1759 = vmatpush1.bf16.msra.mxu1 %v4311_v17  ;;  %1406 = vmatpush1.bf16.msra.mxu0 %v4312_v18  ;;  %v4379_v2 = vld [vmem:[%s4924_s20 + $0x80] ss:$8 sps:$4 sm:$0xff]   ;;  %v4380_v3 = vld [vmem:[%s4924_s20 + $0x94] ss:$8 sps:$4 sm:$0xff]   ;;  %v4382_v4 = vld [vmem:[%s4924_s20 + $0x90] ss:$8 sps:$4 sm:$0xff]  }
  0x82   : > { %1760 = vmatprep.subr.bf16.mxu1 %v4691_v0  ;;  %1407 = vmatprep.subr.bf16.mxu0 %v4313_v19  ;;  %v4383_v5 = vld [vmem:[%s4924_s20 + $0xa4] ss:$8 sps:$4 sm:$0xff]   ;;  %v4385_v6 = vld [vmem:[%s4924_s20 + $0xa0] ss:$8 sps:$4 sm:$0xff]   ;;  %v4386_v7 = vld [vmem:[%s4924_s20 + $0xb4] ss:$8 sps:$4 sm:$0xff]  }
  0x83   : > { %v4388_v8 = vld [vmem:[%s4924_s20 + $0xb0] ss:$8 sps:$4 sm:$0xff]   ;;  %v4389_v9 = vld [vmem:[%s4924_s20 + $0xc4] ss:$8 sps:$4 sm:$0xff]   ;;  %v4391_v10 = vld [vmem:[%s4924_s20 + $0xc0] ss:$8 sps:$4 sm:$0xff]  }
  0x84   : > { %v4392_v11 = vld [vmem:[%s4924_s20 + $0xd4] ss:$8 sps:$4 sm:$0xff]   ;;  %v4394_v12 = vld [vmem:[%s4924_s20 + $0xd0] ss:$8 sps:$4 sm:$0xff]   ;;  %v4395_v13 = vld [vmem:[%s4924_s20 + $0xe4] ss:$8 sps:$4 sm:$0xff]  }
  0x85   : > { %1761 = vmatpush1.bf16.msra.mxu1 %v4315_v20  ;;  %1408 = vmatpush1.bf16.msra.mxu0 %v4316_v21  ;;  %v4397_v14 = vld [vmem:[%s4924_s20 + $0xe0] ss:$8 sps:$4 sm:$0xff]   ;;  %v4398_v15 = vld [vmem:[%s4924_s20 + $0xf4] ss:$8 sps:$4 sm:$0xff]   ;;  %v4400_v16 = vld [vmem:[%s4924_s20 + $0xf0] ss:$8 sps:$4 sm:$0xff]  }
  0x86   : > { %1762 = vmatprep.subr.bf16.mxu1 %v4691_v0  ;;  %1409 = vmatprep.subr.bf16.mxu0 %v4317_v22  ;;  %v4401_v17 = vld [vmem:[%s4924_s20 + $0x104] ss:$8 sps:$4 sm:$0xff]   ;;  %v4403_v18 = vld [vmem:[%s4924_s20 + $0x100] ss:$8 sps:$4 sm:$0xff]   ;;  %v4404_v19 = vld [vmem:[%s4924_s20 + $0x114] ss:$8 sps:$4 sm:$0xff]  }
  0x87   : > { %v4406_v20 = vld [vmem:[%s4924_s20 + $0x110] ss:$8 sps:$4 sm:$0xff]   ;;  %v4407_v21 = vld [vmem:[%s4924_s20 + $0x124] ss:$8 sps:$4 sm:$0xff]   ;;  %v4409_v22 = vld [vmem:[%s4924_s20 + $0x120] ss:$8 sps:$4 sm:$0xff]  }
  0x88   : > { %s262_s30 = scalar_lea.vmem [#allocation8], %s4141_s28  ;;  %s4142_s26 = smul.u32 768, %s292_s29 }
  0x89   : > { %1763 = vmatpush1.bf16.msra.mxu1 %v4319_v23  ;;  %1410 = vmatpush1.bf16.msra.mxu0 %v4320_v24  ;;  %v4410_v23 = vld [vmem:[%s4924_s20 + $0x134] ss:$8 sps:$4 sm:$0xff]   ;;  %v4412_v24 = vld [vmem:[%s4924_s20 + $0x130] ss:$8 sps:$4 sm:$0xff]   ;;  %s5532_s22 = sld [smem:[#allocation16_spill]]  ;;  %s5413_s14 = scalar_lea.sflag [#allocation5], %s292_s29 }
  0x8a   : > { %1764 = vmatprep.subr.bf16.mxu1 %v4691_v0  ;;  %1411 = vmatprep.subr.bf16.mxu0 %v4321_v25  ;;  %v4413_v25 = vld [vmem:[%s4924_s20 + $0x144] ss:$8 sps:$4 sm:$0xff]   ;;  %s5070_s15 = scalar_lea.vmem [#allocation9], %s4142_s26  ;;  %s5533_s27 = sld [smem:[#allocation17_spill]] }
  0x8b   : > { %s3610_s18 = sshll.u32 %s5070_s15, 4  ;;  %s5534_s3 = sld [smem:[#allocation27_spill]]  ;;  %s5408_s18 = int_to_ptr.vmem [resolvable:$true] %s3610_s18 }
  0x8c   : > { %s4692_s0 = smov [#allocation9]  }
  0x8d   : > { %1765 = vmatpush2.bf16.msra.mxu1 %v4323_v26  ;;  %1412 = vmatpush2.bf16.msra.mxu0 %v4324_v27  ;;  %v4415_v26 = vld [vmem:[%s4924_s20 + $0x140] ss:$8 sps:$4 sm:$0xff]   ;;  %v4416_v27 = vld [vmem:[%s4924_s20 + $0x154] ss:$8 sps:$4 sm:$0xff]   ;;  %s4537_s23 = sshll.u32 %s4692_s0, 4  ;;  %s4538_s23 = int_to_ptr.vmem [resolvable:$false] %s4537_s23 }
  0x8e   : > { %1766 = vmatprep.subr.bf16.mxu1 %v4691_v0  ;;  %1413 = vmatprep.subr.bf16.mxu0 %v4325_v28  ;;  %v4418_v28 = vld [vmem:[%s4924_s20 + $0x150] ss:$8 sps:$4 sm:$0xff]   ;;  %s4539_s24 = scalar_lea.vmem %s4538_s23, 24576  ;;  %p4540_p8 = scmp.lt.s32.totalorder %s5408_s18, %s4538_s23 }
  0x8f   : > { %s3602_s7 = smul.u32 3, %s5532_s22 }
  0x90   : > { %s4143_s10 = smul.u32 384, %s5533_s27 }
  0x91   : > { %1767 = vmatpush2.bf16.msra.mxu1 %v4327_v29  ;;  %1414 = vmatpush2.bf16.msra.mxu0 %v4328_v30  ;;  %v4419_v29 = vld [vmem:[%s4924_s20 + $0x164] ss:$8 sps:$4 sm:$0xff]   ;;  %v4421_v30 = vld [vmem:[%s4924_s20 + $0x160] ss:$8 sps:$4 sm:$0xff]  }
  0x92   : > { %1768 = vmatprep.subr.bf16.mxu1 %v4691_v0  ;;  %1415 = vmatprep.subr.bf16.mxu0 %v4329_v31  ;;  %v4422_v31 = vld [vmem:[%s4924_s20 + $0x174] ss:$8 sps:$4 sm:$0xff]   ;;  %s3607_s4 = sadd.s32 %s4143_s10, %s3602_s7 }
  0x93   : > { %s4003_s1 = sshll.u32 %s3607_s4, 6 }
  0x94   : > { %s5405_s12 = scalar_lea.hbm %s5534_s3, %s4003_s1 }
  0x95   : > { %1769 = vmatpush2.bf16.msra.mxu1 %v4331_v33  ;;  %1416 = vmatpush2.bf16.msra.mxu0 %v4332_v34  ;;  %v4424_v33 = vld [vmem:[%s4924_s20 + $0x170] ss:$8 sps:$4 sm:$0xff]   ;;  %v4425_v34 = vld [vmem:[%s4924_s20 + $0x184] ss:$8 sps:$4 sm:$0xff]  }
  0x96   : > { %1770 = vmatprep.subr.bf16.mxu1 %v4691_v0  ;;  %1417 = vmatprep.subr.bf16.mxu0 %v4333_v35  ;;  %v2619_v35 = vshrl.u32 %v2618_v32, 7 }
  0x99   : > { %1771 = vmatpush2.bf16.msra.mxu1 %v4335_v36  ;;  %1418 = vmatpush2.bf16.msra.mxu0 %v4336_v37  ;;  %v2628_v36 = vsub.s32 2, %v2619_v35  ;;  %v2616_v37 = vld [vmem:[%s262_s30] sm:$0x7] }
  0x9a   : > { %1772 = vmatprep.subr.bf16.mxu1 %v4691_v0  ;;  %1419 = vmatprep.subr.bf16.mxu0 %v4337_v38  ;;  %v4427_v38 = vld [vmem:[%s4924_s20 + $0x180] ss:$8 sps:$4 sm:$0xff]  }
  0x9d   : > { %1773 = vmatpush2.bf16.msra.mxu1 %v4339_v39  ;;  %1420 = vmatpush2.bf16.msra.mxu0 %v4340_v40  ;;  %v2620_v39 = vsub.s32 0, %v2619_v35  ;;  %v2624_v40 = vsub.s32 1, %v2619_v35 }
  0x9e   : > { %1774 = vmatprep.subr.bf16.mxu1 %v4691_v0  ;;  %1421 = vmatprep.subr.bf16.mxu0 %v4341_v41  ;;  %v5057_v41 = vrot.slane %v2616_v37, %v2628_v36 }
  0xa1   : > { %1775 = vmatpush2.bf16.msra.mxu1 %v4343_v42  ;;  %1422 = vmatpush2.bf16.msra.mxu0 %v4344_v43  ;;  %v4428_v42 = vld [vmem:[%s4924_s20 + $0x194] ss:$8 sps:$4 sm:$0xff]  }
  0xa2   : > { %1776 = vmatprep.subr.bf16.mxu1 %v4691_v0  ;;  %1423 = vmatprep.subr.bf16.mxu0 %v4345_v44  ;;  %v5062_v44 = vrot.slane %v2616_v37, %v2620_v39 }
  0xa5   : > { %1777 = vmatpush2.bf16.msra.mxu1 %v4347_v45  ;;  %1424 = vmatpush2.bf16.msra.mxu0 %v4348_v46  ;;  %v5064_v45 = vrot.slane %v2616_v37, %v2624_v40 }
  0xa6   : > { %1778 = vmatprep.subr.bf16.mxu1 %v4691_v0  ;;  %1425 = vmatprep.subr.bf16.mxu0 %v4349_v47  ;;  %v4376_v0 = vld [vmem:[%s4924_s20 + $0x70] ss:$8 sps:$4 sm:$0xff]  }
  0xa9   : > { %1779 = vmatpush2.bf16.msra.mxu1 %v4351_v48  ;;  %1426 = vmatpush2.bf16.msra.mxu0 %v4352_v49 }
  0xac   : > { %1781 = vmatmul.mubr.bf16.vlgmr.msra.gmra.mxu1 %v4353_v50  ;;  %1428 = vmatmul.mubr.bf16.vlgmr.msra.gmra.mxu0 %v4353_v50 }
  0xad   : > { %1788 = vmatprep.mubr.bf16.mxu1 %v4356_v51  ;;  %1437 = vmatprep.mubr.bf16.mxu0 %v4356_v51 }
  0xb4   : > { %1789 = vmatmul.mubr.bf16.gmra.mxu1 %v4358_v52  ;;  %1438 = vmatmul.mubr.bf16.gmra.mxu0 %v4358_v52 }
  0xb5   : > { %1796 = vmatprep.mubr.bf16.mxu1 %v4359_v53  ;;  %1447 = vmatprep.mubr.bf16.mxu0 %v4359_v53 }
  0xbc   : > { %1797 = vmatmul.mubr.bf16.gmra.mxu1 %v4361_v54  ;;  %1448 = vmatmul.mubr.bf16.gmra.mxu0 %v4361_v54  ;;  %v4430_v54 = vld [vmem:[%s4924_s20 + $0x190] ss:$8 sps:$4 sm:$0xff]  }
  0xbd   : > { %1804 = vmatprep.mubr.bf16.mxu1 %v4362_v55  ;;  %1457 = vmatprep.mubr.bf16.mxu0 %v4362_v55 }
  0xc4   : > { %1805 = vmatmul.mubr.bf16.gmra.mxu1 %v4364_v56  ;;  %1458 = vmatmul.mubr.bf16.gmra.mxu0 %v4364_v56 }
  0xc5   : > { %1812 = vmatprep.mubr.bf16.mxu1 %v4365_v57  ;;  %1467 = vmatprep.mubr.bf16.mxu0 %v4365_v57  ;;  %v4431_v57 = vld [vmem:[%s4924_s20 + $0x1a4] ss:$8 sps:$4 sm:$0xff]  }
  0xcc   : > { %1813 = vmatmul.mubr.bf16.gmra.mxu1 %v4367_v58  ;;  %1468 = vmatmul.mubr.bf16.gmra.mxu0 %v4367_v58 }
  0xcd   : > { %1820 = vmatprep.mubr.bf16.mxu1 %v4368_v59  ;;  %1477 = vmatprep.mubr.bf16.mxu0 %v4368_v59 }
  0xd4   : > { %1821 = vmatmul.mubr.bf16.gmra.mxu1 %v4370_v60  ;;  %1478 = vmatmul.mubr.bf16.gmra.mxu0 %v4370_v60 }
  0xd5   : > { %1828 = vmatprep.mubr.bf16.mxu1 %v4371_v61  ;;  %1487 = vmatprep.mubr.bf16.mxu0 %v4371_v61 }
  0xdc   : > { %1829 = vmatmul.mubr.bf16.gmra.mxu1 %v4373_v62  ;;  %1488 = vmatmul.mubr.bf16.gmra.mxu0 %v4373_v62 }
  0xdd   : > { %1836 = vmatprep.mubr.bf16.mxu1 %v4374_v63  ;;  %1497 = vmatprep.mubr.bf16.mxu0 %v4374_v63 }
  0xe4   : > { %1837 = vmatmul.mubr.bf16.gmra.mxu1 %v4376_v0  ;;  %1498 = vmatmul.mubr.bf16.gmra.mxu0 %v4376_v0 }
  0xe5   : > { %1844 = vmatprep.mubr.bf16.mxu1 %v4377_v1  ;;  %1507 = vmatprep.mubr.bf16.mxu0 %v4377_v1 }
  0xec   : > { %1845 = vmatmul.mubr.bf16.gmra.mxu1 %v4379_v2  ;;  %1508 = vmatmul.mubr.bf16.gmra.mxu0 %v4379_v2 }
  0xed   : > { %1852 = vmatprep.mubr.bf16.mxu1 %v4380_v3  ;;  %1517 = vmatprep.mubr.bf16.mxu0 %v4380_v3 }
  0xf4   : > { %1853 = vmatmul.mubr.bf16.gmra.mxu1 %v4382_v4  ;;  %1518 = vmatmul.mubr.bf16.gmra.mxu0 %v4382_v4 }
  0xf5   : > { %1860 = vmatprep.mubr.bf16.mxu1 %v4383_v5  ;;  %1527 = vmatprep.mubr.bf16.mxu0 %v4383_v5 }
  0xfc   : > { %1861 = vmatmul.mubr.bf16.gmra.mxu1 %v4385_v6  ;;  %1528 = vmatmul.mubr.bf16.gmra.mxu0 %v4385_v6 }
  0xfd   : > { %1868 = vmatprep.mubr.bf16.mxu1 %v4386_v7  ;;  %1537 = vmatprep.mubr.bf16.mxu0 %v4386_v7 }
 0x104   : > { %1869 = vmatmul.mubr.bf16.gmra.mxu1 %v4388_v8  ;;  %1538 = vmatmul.mubr.bf16.gmra.mxu0 %v4388_v8 }
 0x105   : > { %1876 = vmatprep.mubr.bf16.mxu1 %v4389_v9  ;;  %1547 = vmatprep.mubr.bf16.mxu0 %v4389_v9 }
 0x10c   : > { %1877 = vmatmul.mubr.bf16.gmra.mxu1 %v4391_v10  ;;  %1548 = vmatmul.mubr.bf16.gmra.mxu0 %v4391_v10  ;;  %v4433_v10 = vld [vmem:[%s4924_s20 + $0x1a0] ss:$8 sps:$4 sm:$0xff]  }
 0x10d   : > { %1884 = vmatprep.mubr.bf16.mxu1 %v4392_v11  ;;  %1557 = vmatprep.mubr.bf16.mxu0 %v4392_v11 }
 0x114   : > { %1885 = vmatmul.mubr.bf16.gmra.mxu1 %v4394_v12  ;;  %1558 = vmatmul.mubr.bf16.gmra.mxu0 %v4394_v12 }
 0x115   : > { %1892 = vmatprep.mubr.bf16.mxu1 %v4395_v13  ;;  %1567 = vmatprep.mubr.bf16.mxu0 %v4395_v13  ;;  %v4434_v13 = vld [vmem:[%s4924_s20 + $0x1b4] ss:$8 sps:$4 sm:$0xff]  }
 0x11c   : > { %1893 = vmatmul.mubr.bf16.gmra.mxu1 %v4397_v14  ;;  %1568 = vmatmul.mubr.bf16.gmra.mxu0 %v4397_v14 }
 0x11d   : > { %1900 = vmatprep.mubr.bf16.mxu1 %v4398_v15  ;;  %1577 = vmatprep.mubr.bf16.mxu0 %v4398_v15 }
 0x124   : > { %1901 = vmatmul.mubr.bf16.gmra.mxu1 %v4400_v16  ;;  %1578 = vmatmul.mubr.bf16.gmra.mxu0 %v4400_v16 }
 0x125   : > { %1908 = vmatprep.mubr.bf16.mxu1 %v4401_v17  ;;  %1587 = vmatprep.mubr.bf16.mxu0 %v4401_v17 }
 0x12c   : > { %1909 = vmatmul.mubr.bf16.gmra.mxu1 %v4403_v18  ;;  %1588 = vmatmul.mubr.bf16.gmra.mxu0 %v4403_v18 }
 0x12d   : > { %1916 = vmatprep.mubr.bf16.mxu1 %v4404_v19  ;;  %1597 = vmatprep.mubr.bf16.mxu0 %v4404_v19 }
 0x134   : > { %1917 = vmatmul.mubr.bf16.gmra.mxu1 %v4406_v20  ;;  %1598 = vmatmul.mubr.bf16.gmra.mxu0 %v4406_v20 }
 0x135   : > { %1924 = vmatprep.mubr.bf16.mxu1 %v4407_v21  ;;  %1607 = vmatprep.mubr.bf16.mxu0 %v4407_v21 }
 0x13c   : > { %1925 = vmatmul.mubr.bf16.gmra.mxu1 %v4409_v22  ;;  %1608 = vmatmul.mubr.bf16.gmra.mxu0 %v4409_v22 }
 0x13d   : > { %1932 = vmatprep.mubr.bf16.mxu1 %v4410_v23  ;;  %1617 = vmatprep.mubr.bf16.mxu0 %v4410_v23 }
 0x144   : > { %1933 = vmatmul.mubr.bf16.gmra.mxu1 %v4412_v24  ;;  %1618 = vmatmul.mubr.bf16.gmra.mxu0 %v4412_v24 }
 0x145   : > { %1940 = vmatprep.mubr.bf16.mxu1 %v4413_v25  ;;  %1627 = vmatprep.mubr.bf16.mxu0 %v4413_v25 }
 0x14c   : > { %1941 = vmatmul.mubr.bf16.gmra.mxu1 %v4415_v26  ;;  %1628 = vmatmul.mubr.bf16.gmra.mxu0 %v4415_v26 }
 0x14d   : > { %1948 = vmatprep.mubr.bf16.mxu1 %v4416_v27  ;;  %1637 = vmatprep.mubr.bf16.mxu0 %v4416_v27 }
 0x154   : > { %1949 = vmatmul.mubr.bf16.gmra.mxu1 %v4418_v28  ;;  %1638 = vmatmul.mubr.bf16.gmra.mxu0 %v4418_v28 }
 0x155   : > { %1956 = vmatprep.mubr.bf16.mxu1 %v4419_v29  ;;  %1647 = vmatprep.mubr.bf16.mxu0 %v4419_v29 }
 0x15c   : > { %1957 = vmatmul.mubr.bf16.gmra.mxu1 %v4421_v30  ;;  %1648 = vmatmul.mubr.bf16.gmra.mxu0 %v4421_v30  ;;  %v4436_v30 = vld [vmem:[%s4924_s20 + $0x1b0] ss:$8 sps:$4 sm:$0xff]  }
 0x15d   : > { %1964 = vmatprep.mubr.bf16.mxu1 %v4422_v31  ;;  %1657 = vmatprep.mubr.bf16.mxu0 %v4422_v31 }
 0x164   : > { %1965 = vmatmul.mubr.bf16.gmra.mxu1 %v4424_v33  ;;  %1658 = vmatmul.mubr.bf16.gmra.mxu0 %v4424_v33  ;;  %v4439_v33 = vld [vmem:[%s4924_s20 + $0x1c4] ss:$8 sps:$4 sm:$0xff]  }
 0x165   : > { %1972 = vmatprep.mubr.bf16.mxu1 %v4425_v34  ;;  %1667 = vmatprep.mubr.bf16.mxu0 %v4425_v34 }
 0x16c   : > { %v1782_v43 = vpop.f32.mrf.mxu1  ;;  %1973 = vmatmul.mubr.bf16.gmra.mxu1 %v4427_v38  ;;  %v1429_v47 = vpop.f32.mrf.mxu0  ;;  %1668 = vmatmul.mubr.bf16.gmra.mxu0 %v4427_v38 }
 0x16d   : > { %v2635_v46 = vadd.f32 %v5057_v41, %v1782_v43  ;;  %1980 = vmatprep.mubr.bf16.mxu1 %v4428_v42  ;;  %1677 = vmatprep.mubr.bf16.mxu0 %v4428_v42  ;;  %v2633_v51 = vadd.f32 %v5062_v44, %v1429_v47 }
 0x16e   : > { %v1784_v48 = vpop.f32.mrf.mxu1  ;;  %v1431_v50 = vpop.f32.mrf.mxu0 }
 0x16f   : > { %v4011_v49 = vpack.c.bf16 %v2635_v46, %v2635_v46  ;;  %v2634_v52 = vadd.f32 %v5064_v45, %v1431_v50 }
 0x170   : > { %v1785_v53 = vpop.f32.mrf.mxu1  ;;  %v1433_v56 = vpop.f32.mrf.mxu0 }
 0x171   : > { %3466 = vst [vmem:[%s5070_s15 + $0x8] sm:$0xf] %v4011_v49  ;;  %v2638_v55 = vadd.f32 %v5057_v41, %v1785_v53  ;;  %v4010_v58 = vpack.c.bf16 %v2634_v52, %v2633_v51  ;;  %v2636_v62 = vadd.f32 %v5062_v44, %v1433_v56  ;;  %v4437_v53 = vld [vmem:[%s4924_s20 + $0x1c0] ss:$8 sps:$4 sm:$0xff]   ;;  %v4442_v56 = vld [vmem:[%s4924_s20 + $0x1d4] ss:$8 sps:$4 sm:$0xff]  }
 0x172   : > { %v1787_v59 = vpop.f32.mrf.mxu1  ;;  %v1435_v61 = vpop.f32.mrf.mxu0 }
 0x173   : > { %v4013_v60 = vpack.c.bf16 %v2638_v55, %v2638_v55  ;;  %3465 = vst [vmem:[%s5070_s15] sm:$0xff] %v4010_v58  ;;  %v2637_v63 = vadd.f32 %v5064_v45, %v1435_v61 }
 0x174   : > { %v1790_v0 = vpop.f32.mrf.mxu1  ;;  %1981 = vmatmul.mubr.bf16.gmra.mxu1 %v4430_v54  ;;  %v1439_v2 = vpop.f32.mrf.mxu0  ;;  %1678 = vmatmul.mubr.bf16.gmra.mxu0 %v4430_v54 }
 0x175   : > { %3468 = vst [vmem:[%s5070_s15 + $0x14] sm:$0xf] %v4013_v60  ;;  %v2641_v1 = vadd.f32 %v5057_v41, %v1790_v0  ;;  %1988 = vmatprep.mubr.bf16.mxu1 %v4431_v57  ;;  %v4012_v3 = vpack.c.bf16 %v2637_v63, %v2636_v62  ;;  %1687 = vmatprep.mubr.bf16.mxu0 %v4431_v57 }
 0x176   : > { %v1792_v4 = vpop.f32.mrf.mxu1  ;;  %v1441_v6 = vpop.f32.mrf.mxu0  ;;  %v2639_v7 = vadd.f32 %v5062_v44, %v1439_v2 }
 0x177   : > { %v4015_v5 = vpack.c.bf16 %v2641_v1, %v2641_v1  ;;  %3467 = vst [vmem:[%s5070_s15 + $0xc] sm:$0xff] %v4012_v3  ;;  %v2640_v8 = vadd.f32 %v5064_v45, %v1441_v6 }
 0x178   : > { %v1793_v9 = vpop.f32.mrf.mxu1  ;;  %v1443_v12 = vpop.f32.mrf.mxu0 }
 0x179   : > { %3470 = vst [vmem:[%s5070_s15 + $0x20] sm:$0xf] %v4015_v5  ;;  %v2644_v11 = vadd.f32 %v5057_v41, %v1793_v9  ;;  %v4014_v14 = vpack.c.bf16 %v2640_v8, %v2639_v7  ;;  %v2642_v18 = vadd.f32 %v5062_v44, %v1443_v12  ;;  %v4440_v9 = vld [vmem:[%s4924_s20 + $0x1d0] ss:$8 sps:$4 sm:$0xff]   ;;  %v4445_v12 = vld [vmem:[%s4924_s20 + $0x1e4] ss:$8 sps:$4 sm:$0xff]  }
 0x17a   : > { %v1795_v15 = vpop.f32.mrf.mxu1  ;;  %v1445_v17 = vpop.f32.mrf.mxu0 }
 0x17b   : > { %v4017_v16 = vpack.c.bf16 %v2644_v11, %v2644_v11  ;;  %3469 = vst [vmem:[%s5070_s15 + $0x18] sm:$0xff] %v4014_v14  ;;  %v2643_v19 = vadd.f32 %v5064_v45, %v1445_v17 }
 0x17c   : > { %v1798_v20 = vpop.f32.mrf.mxu1  ;;  %1989 = vmatmul.mubr.bf16.gmra.mxu1 %v4433_v10  ;;  %v1449_v22 = vpop.f32.mrf.mxu0  ;;  %1688 = vmatmul.mubr.bf16.gmra.mxu0 %v4433_v10 }
 0x17d   : > { %3472 = vst [vmem:[%s5070_s15 + $0x2c] sm:$0xf] %v4017_v16  ;;  %v2647_v21 = vadd.f32 %v5057_v41, %v1798_v20  ;;  %1996 = vmatprep.mubr.bf16.mxu1 %v4434_v13  ;;  %v4016_v23 = vpack.c.bf16 %v2643_v19, %v2642_v18  ;;  %1697 = vmatprep.mubr.bf16.mxu0 %v4434_v13 }
 0x17e   : > { %v1800_v24 = vpop.f32.mrf.mxu1  ;;  %v1451_v26 = vpop.f32.mrf.mxu0  ;;  %v2645_v27 = vadd.f32 %v5062_v44, %v1449_v22 }
 0x17f   : > { %v4019_v25 = vpack.c.bf16 %v2647_v21, %v2647_v21  ;;  %3471 = vst [vmem:[%s5070_s15 + $0x24] sm:$0xff] %v4016_v23  ;;  %v2646_v28 = vadd.f32 %v5064_v45, %v1451_v26 }
 0x180   : > { %v1801_v29 = vpop.f32.mrf.mxu1  ;;  %v1453_v32 = vpop.f32.mrf.mxu0 }
 0x181   : > { %3474 = vst [vmem:[%s5070_s15 + $0x38] sm:$0xf] %v4019_v25  ;;  %v2650_v31 = vadd.f32 %v5057_v41, %v1801_v29  ;;  %v4018_v34 = vpack.c.bf16 %v2646_v28, %v2645_v27  ;;  %v2648_v38 = vadd.f32 %v5062_v44, %v1453_v32  ;;  %v4443_v29 = vld [vmem:[%s4924_s20 + $0x1e0] ss:$8 sps:$4 sm:$0xff]   ;;  %v4448_v32 = vld [vmem:[%s4924_s20 + $0x1f4] ss:$8 sps:$4 sm:$0xff]  }
 0x182   : > { %v1803_v35 = vpop.f32.mrf.mxu1  ;;  %v1455_v37 = vpop.f32.mrf.mxu0 }
 0x183   : > { %v4021_v36 = vpack.c.bf16 %v2650_v31, %v2650_v31  ;;  %3473 = vst [vmem:[%s5070_s15 + $0x30] sm:$0xff] %v4018_v34  ;;  %v2649_v39 = vadd.f32 %v5064_v45, %v1455_v37 }
 0x184   : > { %v1806_v40 = vpop.f32.mrf.mxu1  ;;  %1997 = vmatmul.mubr.bf16.gmra.mxu1 %v4436_v30  ;;  %v1459_v43 = vpop.f32.mrf.mxu0  ;;  %1698 = vmatmul.mubr.bf16.gmra.mxu0 %v4436_v30 }
 0x185   : > { %3476 = vst [vmem:[%s5070_s15 + $0x44] sm:$0xf] %v4021_v36  ;;  %v2653_v42 = vadd.f32 %v5057_v41, %v1806_v40  ;;  %2004 = vmatprep.mubr.bf16.mxu1 %v4439_v33  ;;  %v4020_v46 = vpack.c.bf16 %v2649_v39, %v2648_v38  ;;  %1707 = vmatprep.mubr.bf16.mxu0 %v4439_v33 }
 0x186   : > { %v1808_v47 = vpop.f32.mrf.mxu1  ;;  %v1461_v49 = vpop.f32.mrf.mxu0  ;;  %v2651_v50 = vadd.f32 %v5062_v44, %v1459_v43 }
 0x187   : > { %v4023_v48 = vpack.c.bf16 %v2653_v42, %v2653_v42  ;;  %3475 = vst [vmem:[%s5070_s15 + $0x3c] sm:$0xff] %v4020_v46  ;;  %v2652_v51 = vadd.f32 %v5064_v45, %v1461_v49 }
 0x188   : > { %v1809_v52 = vpop.f32.mrf.mxu1  ;;  %v1463_v55 = vpop.f32.mrf.mxu0 }
 0x189   : > { %3478 = vst [vmem:[%s5070_s15 + $0x50] sm:$0xf] %v4023_v48  ;;  %v2656_v54 = vadd.f32 %v5057_v41, %v1809_v52  ;;  %v4022_v57 = vpack.c.bf16 %v2652_v51, %v2651_v50  ;;  %v2654_v61 = vadd.f32 %v5062_v44, %v1463_v55  ;;  %v4446_v52 = vld [vmem:[%s4924_s20 + $0x1f0] ss:$8 sps:$4 sm:$0xff]   ;;  %s4533_s20 = scalar_lea.vmem %s5408_s18, 12288 }
 0x18a   : > { %v1811_v58 = vpop.f32.mrf.mxu1  ;;  %v1465_v60 = vpop.f32.mrf.mxu0  ;;  %p4534_p5 = scmp.ne.s32.totalorder %s5408_s18, %s4533_s20  ;;  %p4541_p13 = scmp.lt.s32.totalorder %s4539_s24, %s4533_s20 }
 0x18b   : > { %v4025_v59 = vpack.c.bf16 %v2656_v54, %v2656_v54  ;;  %3477 = vst [vmem:[%s5070_s15 + $0x48] sm:$0xff] %v4022_v57  ;;  %v2655_v62 = vadd.f32 %v5064_v45, %v1465_v60 }
 0x18c   : > { %v1814_v63 = vpop.f32.mrf.mxu1  ;;  %2005 = vmatmul.mubr.bf16.gmra.mxu1 %v4437_v53  ;;  %v1469_v1 = vpop.f32.mrf.mxu0  ;;  %1708 = vmatmul.mubr.bf16.gmra.mxu0 %v4437_v53  ;;  %p4535_p7 = pnand %p4534_p5, %p4882_p2  ;;  %p4542_p6 = por %p4541_p13, %p4540_p8 }
 0x18d   : > { %3480 = vst [vmem:[%s5070_s15 + $0x5c] sm:$0xf] %v4025_v59  ;;  %v2659_v0 = vadd.f32 %v5057_v41, %v1814_v63  ;;  %2012 = vmatprep.mubr.bf16.mxu1 %v4442_v56  ;;  %v4024_v2 = vpack.c.bf16 %v2655_v62, %v2654_v61  ;;  %1717 = vmatprep.mubr.bf16.mxu0 %v4442_v56 }
 0x18e   : > { %v1816_v3 = vpop.f32.mrf.mxu1  ;;  %v1471_v5 = vpop.f32.mrf.mxu0  ;;  %v2657_v6 = vadd.f32 %v5062_v44, %v1469_v1  ;;  %p4536_p1 = pneg %p4535_p7 }
 0x18f   : > { %v4027_v4 = vpack.c.bf16 %v2659_v0, %v2659_v0  ;;  %3479 = vst [vmem:[%s5070_s15 + $0x54] sm:$0xff] %v4024_v2  ;;  %v2658_v7 = vadd.f32 %v5064_v45, %v1471_v5 }
 0x190   : > { %v1817_v8 = vpop.f32.mrf.mxu1  ;;  %v1473_v11 = vpop.f32.mrf.mxu0  ;;  %p4543_p9 = pnand %p4542_p6, %p4536_p1 }
 0x191   : > { %3482 = vst [vmem:[%s5070_s15 + $0x68] sm:$0xf] %v4027_v4  ;;  %v2662_v10 = vadd.f32 %v5057_v41, %v1817_v8  ;;  %v4026_v13 = vpack.c.bf16 %v2658_v7, %v2657_v6  ;;  %v2660_v17 = vadd.f32 %v5062_v44, %v1473_v11 }
 0x192   : > { %v1819_v14 = vpop.f32.mrf.mxu1  ;;  %v1475_v16 = vpop.f32.mrf.mxu0 }
 0x193   : > { %v4029_v15 = vpack.c.bf16 %v2662_v10, %v2662_v10  ;;  %3481 = vst [vmem:[%s5070_s15 + $0x60] sm:$0xff] %v4026_v13  ;;  %v2661_v18 = vadd.f32 %v5064_v45, %v1475_v16 }
 0x194   : > { %v1822_v19 = vpop.f32.mrf.mxu1  ;;  %2013 = vmatmul.mubr.bf16.gmra.mxu1 %v4440_v9  ;;  %v1479_v21 = vpop.f32.mrf.mxu0  ;;  %1718 = vmatmul.mubr.bf16.gmra.mxu0 %v4440_v9 }
 0x195   : > { %3484 = vst [vmem:[%s5070_s15 + $0x74] sm:$0xf] %v4029_v15  ;;  %v2665_v20 = vadd.f32 %v5057_v41, %v1822_v19  ;;  %2020 = vmatprep.mubr.bf16.mxu1 %v4445_v12  ;;  %v4028_v22 = vpack.c.bf16 %v2661_v18, %v2660_v17  ;;  %1727 = vmatprep.mubr.bf16.mxu0 %v4445_v12 }
 0x196   : > { %v1824_v23 = vpop.f32.mrf.mxu1  ;;  %v1481_v25 = vpop.f32.mrf.mxu0  ;;  %v2663_v26 = vadd.f32 %v5062_v44, %v1479_v21 }
 0x197   : > { %v4031_v24 = vpack.c.bf16 %v2665_v20, %v2665_v20  ;;  %3483 = vst [vmem:[%s5070_s15 + $0x6c] sm:$0xff] %v4028_v22  ;;  %v2664_v27 = vadd.f32 %v5064_v45, %v1481_v25 }
 0x198   : > { %v1825_v28 = vpop.f32.mrf.mxu1  ;;  %v1483_v31 = vpop.f32.mrf.mxu0 }
 0x199   : > { %3486 = vst [vmem:[%s5070_s15 + $0x80] sm:$0xf] %v4031_v24  ;;  %v2668_v30 = vadd.f32 %v5057_v41, %v1825_v28  ;;  %v4030_v33 = vpack.c.bf16 %v2664_v27, %v2663_v26  ;;  %v2666_v37 = vadd.f32 %v5062_v44, %v1483_v31 }
 0x19a   : > { %v1827_v34 = vpop.f32.mrf.mxu1  ;;  %v1485_v36 = vpop.f32.mrf.mxu0 }
 0x19b   : > { %v4033_v35 = vpack.c.bf16 %v2668_v30, %v2668_v30  ;;  %3485 = vst [vmem:[%s5070_s15 + $0x78] sm:$0xff] %v4030_v33  ;;  %v2667_v38 = vadd.f32 %v5064_v45, %v1485_v36 }
 0x19c   : > { %v1830_v39 = vpop.f32.mrf.mxu1  ;;  %2021 = vmatmul.mubr.bf16.gmra.mxu1 %v4443_v29  ;;  %v1489_v42 = vpop.f32.mrf.mxu0  ;;  %1728 = vmatmul.mubr.bf16.gmra.mxu0 %v4443_v29 }
 0x19d   : > { %3488 = vst [vmem:[%s5070_s15 + $0x8c] sm:$0xf] %v4033_v35  ;;  %v2671_v40 = vadd.f32 %v5057_v41, %v1830_v39  ;;  %2028 = vmatprep.mubr.bf16.mxu1 %v4448_v32  ;;  %v4032_v43 = vpack.c.bf16 %v2667_v38, %v2666_v37  ;;  %1737 = vmatprep.mubr.bf16.mxu0 %v4448_v32 }
 0x19e   : > { %v1832_v46 = vpop.f32.mrf.mxu1  ;;  %v1491_v48 = vpop.f32.mrf.mxu0  ;;  %v2669_v49 = vadd.f32 %v5062_v44, %v1489_v42 }
 0x19f   : > { %v4035_v47 = vpack.c.bf16 %v2671_v40, %v2671_v40  ;;  %3487 = vst [vmem:[%s5070_s15 + $0x84] sm:$0xff] %v4032_v43  ;;  %v2670_v50 = vadd.f32 %v5064_v45, %v1491_v48 }
 0x1a0   : > { %v1833_v51 = vpop.f32.mrf.mxu1  ;;  %v1493_v54 = vpop.f32.mrf.mxu0 }
 0x1a1   : > { %3490 = vst [vmem:[%s5070_s15 + $0x98] sm:$0xf] %v4035_v47  ;;  %v2674_v53 = vadd.f32 %v5057_v41, %v1833_v51  ;;  %v4034_v55 = vpack.c.bf16 %v2670_v50, %v2669_v49  ;;  %v2672_v59 = vadd.f32 %v5062_v44, %v1493_v54 }
 0x1a2   : > { %v1835_v56 = vpop.f32.mrf.mxu1  ;;  %v1495_v58 = vpop.f32.mrf.mxu0 }
 0x1a3   : > { %v4037_v57 = vpack.c.bf16 %v2674_v53, %v2674_v53  ;;  %3489 = vst [vmem:[%s5070_s15 + $0x90] sm:$0xff] %v4034_v55  ;;  %v2673_v60 = vadd.f32 %v5064_v45, %v1495_v58 }
 0x1a4   : > { %v1838_v61 = vpop.f32.mrf.mxu1  ;;  %2029 = vmatmul.mubr.bf16.gmra.mxu1 %v4446_v52  ;;  %v1499_v63 = vpop.f32.mrf.mxu0  ;;  %1738 = vmatmul.mubr.bf16.gmra.mxu0 %v4446_v52 }
 0x1a5   : > { %3492 = vst [vmem:[%s5070_s15 + $0xa4] sm:$0xf] %v4037_v57  ;;  %v2677_v62 = vadd.f32 %v5057_v41, %v1838_v61  ;;  %v4036_v0 = vpack.c.bf16 %v2673_v60, %v2672_v59  ;;  %v2675_v4 = vadd.f32 %v5062_v44, %v1499_v63 }
 0x1a6   : > { %v1840_v1 = vpop.f32.mrf.mxu1  ;;  %v1501_v3 = vpop.f32.mrf.mxu0 }
 0x1a7   : > { %v4039_v2 = vpack.c.bf16 %v2677_v62, %v2677_v62  ;;  %3491 = vst [vmem:[%s5070_s15 + $0x9c] sm:$0xff] %v4036_v0  ;;  %v2676_v5 = vadd.f32 %v5064_v45, %v1501_v3 }
 0x1a8   : > { %v1841_v6 = vpop.f32.mrf.mxu1  ;;  %v1503_v8 = vpop.f32.mrf.mxu0 }
 0x1a9   : > { %3494 = vst [vmem:[%s5070_s15 + $0xb0] sm:$0xf] %v4039_v2  ;;  %v2680_v7 = vadd.f32 %v5057_v41, %v1841_v6  ;;  %v4038_v9 = vpack.c.bf16 %v2676_v5, %v2675_v4  ;;  %v2678_v13 = vadd.f32 %v5062_v44, %v1503_v8 }
 0x1aa   : > { %v1843_v10 = vpop.f32.mrf.mxu1  ;;  %v1505_v12 = vpop.f32.mrf.mxu0 }
 0x1ab   : > { %v4041_v11 = vpack.c.bf16 %v2680_v7, %v2680_v7  ;;  %3493 = vst [vmem:[%s5070_s15 + $0xa8] sm:$0xff] %v4038_v9  ;;  %v2679_v14 = vadd.f32 %v5064_v45, %v1505_v12 }
 0x1ac   : > { %v1846_v15 = vpop.f32.mrf.mxu1  ;;  %v1509_v17 = vpop.f32.mrf.mxu0 }
 0x1ad   : > { %3496 = vst [vmem:[%s5070_s15 + $0xbc] sm:$0xf] %v4041_v11  ;;  %v2683_v16 = vadd.f32 %v5057_v41, %v1846_v15  ;;  %v4040_v18 = vpack.c.bf16 %v2679_v14, %v2678_v13  ;;  %v2681_v22 = vadd.f32 %v5062_v44, %v1509_v17 }
 0x1ae   : > { %v1848_v19 = vpop.f32.mrf.mxu1  ;;  %v1511_v21 = vpop.f32.mrf.mxu0 }
 0x1af   : > { %v4043_v20 = vpack.c.bf16 %v2683_v16, %v2683_v16  ;;  %3495 = vst [vmem:[%s5070_s15 + $0xb4] sm:$0xff] %v4040_v18  ;;  %v2682_v23 = vadd.f32 %v5064_v45, %v1511_v21 }
 0x1b0   : > { %v1849_v24 = vpop.f32.mrf.mxu1  ;;  %v1513_v26 = vpop.f32.mrf.mxu0 }
 0x1b1   : > { %3498 = vst [vmem:[%s5070_s15 + $0xc8] sm:$0xf] %v4043_v20  ;;  %v2686_v25 = vadd.f32 %v5057_v41, %v1849_v24  ;;  %v4042_v27 = vpack.c.bf16 %v2682_v23, %v2681_v22  ;;  %v2684_v31 = vadd.f32 %v5062_v44, %v1513_v26 }
 0x1b2   : > { %v1851_v28 = vpop.f32.mrf.mxu1  ;;  %v1515_v30 = vpop.f32.mrf.mxu0 }
 0x1b3   : > { %v4045_v29 = vpack.c.bf16 %v2686_v25, %v2686_v25  ;;  %3497 = vst [vmem:[%s5070_s15 + $0xc0] sm:$0xff] %v4042_v27  ;;  %v2685_v32 = vadd.f32 %v5064_v45, %v1515_v30 }
 0x1b4   : > { %v1854_v33 = vpop.f32.mrf.mxu1  ;;  %v1519_v35 = vpop.f32.mrf.mxu0 }
 0x1b5   : > { %3500 = vst [vmem:[%s5070_s15 + $0xd4] sm:$0xf] %v4045_v29  ;;  %v2689_v34 = vadd.f32 %v5057_v41, %v1854_v33  ;;  %v4044_v36 = vpack.c.bf16 %v2685_v32, %v2684_v31  ;;  %v2687_v40 = vadd.f32 %v5062_v44, %v1519_v35 }
 0x1b6   : > { %v1856_v37 = vpop.f32.mrf.mxu1  ;;  %v1521_v39 = vpop.f32.mrf.mxu0 }
 0x1b7   : > { %v4047_v38 = vpack.c.bf16 %v2689_v34, %v2689_v34  ;;  %3499 = vst [vmem:[%s5070_s15 + $0xcc] sm:$0xff] %v4044_v36  ;;  %v2688_v42 = vadd.f32 %v5064_v45, %v1521_v39 }
 0x1b8   : > { %v1857_v43 = vpop.f32.mrf.mxu1  ;;  %v1523_v47 = vpop.f32.mrf.mxu0 }
 0x1b9   : > { %3502 = vst [vmem:[%s5070_s15 + $0xe0] sm:$0xf] %v4047_v38  ;;  %v2692_v46 = vadd.f32 %v5057_v41, %v1857_v43  ;;  %v4046_v48 = vpack.c.bf16 %v2688_v42, %v2687_v40  ;;  %v2690_v52 = vadd.f32 %v5062_v44, %v1523_v47 }
 0x1ba   : > { %v1859_v49 = vpop.f32.mrf.mxu1  ;;  %v1525_v51 = vpop.f32.mrf.mxu0 }
 0x1bb   : > { %v4049_v50 = vpack.c.bf16 %v2692_v46, %v2692_v46  ;;  %3501 = vst [vmem:[%s5070_s15 + $0xd8] sm:$0xff] %v4046_v48  ;;  %v2691_v53 = vadd.f32 %v5064_v45, %v1525_v51 }
 0x1bc   : > { %v1862_v54 = vpop.f32.mrf.mxu1  ;;  %v1529_v56 = vpop.f32.mrf.mxu0 }
 0x1bd   : > { %3504 = vst [vmem:[%s5070_s15 + $0xec] sm:$0xf] %v4049_v50  ;;  %v2695_v55 = vadd.f32 %v5057_v41, %v1862_v54  ;;  %v4048_v57 = vpack.c.bf16 %v2691_v53, %v2690_v52  ;;  %v2693_v61 = vadd.f32 %v5062_v44, %v1529_v56 }
 0x1be   : > { %v1864_v58 = vpop.f32.mrf.mxu1  ;;  %v1531_v60 = vpop.f32.mrf.mxu0 }
 0x1bf   : > { %v4051_v59 = vpack.c.bf16 %v2695_v55, %v2695_v55  ;;  %3503 = vst [vmem:[%s5070_s15 + $0xe4] sm:$0xff] %v4048_v57  ;;  %v2694_v62 = vadd.f32 %v5064_v45, %v1531_v60 }
 0x1c0   : > { %v1865_v63 = vpop.f32.mrf.mxu1  ;;  %v1533_v1 = vpop.f32.mrf.mxu0 }
 0x1c1   : > { %3506 = vst [vmem:[%s5070_s15 + $0xf8] sm:$0xf] %v4051_v59  ;;  %v2698_v0 = vadd.f32 %v5057_v41, %v1865_v63  ;;  %v4050_v2 = vpack.c.bf16 %v2694_v62, %v2693_v61  ;;  %v2696_v6 = vadd.f32 %v5062_v44, %v1533_v1 }
 0x1c2   : > { %v1867_v3 = vpop.f32.mrf.mxu1  ;;  %v1535_v5 = vpop.f32.mrf.mxu0 }
 0x1c3   : > { %v4053_v4 = vpack.c.bf16 %v2698_v0, %v2698_v0  ;;  %3505 = vst [vmem:[%s5070_s15 + $0xf0] sm:$0xff] %v4050_v2  ;;  %v2697_v7 = vadd.f32 %v5064_v45, %v1535_v5 }
 0x1c4   : > { %v1870_v8 = vpop.f32.mrf.mxu1  ;;  %v1539_v10 = vpop.f32.mrf.mxu0 }
 0x1c5   : > { %3508 = vst [vmem:[%s5070_s15 + $0x104] sm:$0xf] %v4053_v4  ;;  %v2701_v9 = vadd.f32 %v5057_v41, %v1870_v8  ;;  %v4052_v11 = vpack.c.bf16 %v2697_v7, %v2696_v6  ;;  %v2699_v15 = vadd.f32 %v5062_v44, %v1539_v10 }
 0x1c6   : > { %v1872_v12 = vpop.f32.mrf.mxu1  ;;  %v1541_v14 = vpop.f32.mrf.mxu0 }
 0x1c7   : > { %v4055_v13 = vpack.c.bf16 %v2701_v9, %v2701_v9  ;;  %3507 = vst [vmem:[%s5070_s15 + $0xfc] sm:$0xff] %v4052_v11  ;;  %v2700_v16 = vadd.f32 %v5064_v45, %v1541_v14 }
 0x1c8   : > { %v1873_v17 = vpop.f32.mrf.mxu1  ;;  %v1543_v19 = vpop.f32.mrf.mxu0 }
 0x1c9   : > { %3510 = vst [vmem:[%s5070_s15 + $0x110] sm:$0xf] %v4055_v13  ;;  %v2704_v18 = vadd.f32 %v5057_v41, %v1873_v17  ;;  %v4054_v20 = vpack.c.bf16 %v2700_v16, %v2699_v15  ;;  %v2702_v24 = vadd.f32 %v5062_v44, %v1543_v19 }
 0x1ca   : > { %v1875_v21 = vpop.f32.mrf.mxu1  ;;  %v1545_v23 = vpop.f32.mrf.mxu0 }
 0x1cb   : > { %v4057_v22 = vpack.c.bf16 %v2704_v18, %v2704_v18  ;;  %3509 = vst [vmem:[%s5070_s15 + $0x108] sm:$0xff] %v4054_v20  ;;  %v2703_v25 = vadd.f32 %v5064_v45, %v1545_v23 }
 0x1cc   : > { %v1878_v26 = vpop.f32.mrf.mxu1  ;;  %v1549_v28 = vpop.f32.mrf.mxu0 }
 0x1cd   : > { %3512 = vst [vmem:[%s5070_s15 + $0x11c] sm:$0xf] %v4057_v22  ;;  %v2707_v27 = vadd.f32 %v5057_v41, %v1878_v26  ;;  %v4056_v29 = vpack.c.bf16 %v2703_v25, %v2702_v24  ;;  %v2705_v33 = vadd.f32 %v5062_v44, %v1549_v28 }
 0x1ce   : > { %v1880_v30 = vpop.f32.mrf.mxu1  ;;  %v1551_v32 = vpop.f32.mrf.mxu0 }
 0x1cf   : > { %v4059_v31 = vpack.c.bf16 %v2707_v27, %v2707_v27  ;;  %3511 = vst [vmem:[%s5070_s15 + $0x114] sm:$0xff] %v4056_v29  ;;  %v2706_v34 = vadd.f32 %v5064_v45, %v1551_v32 }
 0x1d0   : > { %v1881_v35 = vpop.f32.mrf.mxu1  ;;  %v1553_v37 = vpop.f32.mrf.mxu0 }
 0x1d1   : > { %3514 = vst [vmem:[%s5070_s15 + $0x128] sm:$0xf] %v4059_v31  ;;  %v2710_v36 = vadd.f32 %v5057_v41, %v1881_v35  ;;  %v4058_v38 = vpack.c.bf16 %v2706_v34, %v2705_v33  ;;  %v2708_v43 = vadd.f32 %v5062_v44, %v1553_v37 }
 0x1d2   : > { %v1883_v39 = vpop.f32.mrf.mxu1  ;;  %v1555_v42 = vpop.f32.mrf.mxu0 }
 0x1d3   : > { %v4061_v40 = vpack.c.bf16 %v2710_v36, %v2710_v36  ;;  %3513 = vst [vmem:[%s5070_s15 + $0x120] sm:$0xff] %v4058_v38  ;;  %v2709_v46 = vadd.f32 %v5064_v45, %v1555_v42 }
 0x1d4   : > { %v1886_v47 = vpop.f32.mrf.mxu1  ;;  %v1559_v49 = vpop.f32.mrf.mxu0 }
 0x1d5   : > { %3516 = vst [vmem:[%s5070_s15 + $0x134] sm:$0xf] %v4061_v40  ;;  %v2713_v48 = vadd.f32 %v5057_v41, %v1886_v47  ;;  %v4060_v50 = vpack.c.bf16 %v2709_v46, %v2708_v43  ;;  %v2711_v54 = vadd.f32 %v5062_v44, %v1559_v49 }
 0x1d6   : > { %v1888_v51 = vpop.f32.mrf.mxu1  ;;  %v1561_v53 = vpop.f32.mrf.mxu0 }
 0x1d7   : > { %v4063_v52 = vpack.c.bf16 %v2713_v48, %v2713_v48  ;;  %3515 = vst [vmem:[%s5070_s15 + $0x12c] sm:$0xff] %v4060_v50  ;;  %v2712_v55 = vadd.f32 %v5064_v45, %v1561_v53 }
 0x1d8   : > { %v1889_v56 = vpop.f32.mrf.mxu1  ;;  %v1563_v58 = vpop.f32.mrf.mxu0 }
 0x1d9   : > { %3518 = vst [vmem:[%s5070_s15 + $0x140] sm:$0xf] %v4063_v52  ;;  %v2716_v57 = vadd.f32 %v5057_v41, %v1889_v56  ;;  %v4062_v59 = vpack.c.bf16 %v2712_v55, %v2711_v54  ;;  %v2714_v63 = vadd.f32 %v5062_v44, %v1563_v58 }
 0x1da   : > { %v1891_v60 = vpop.f32.mrf.mxu1  ;;  %v1565_v62 = vpop.f32.mrf.mxu0 }
 0x1db   : > { %v4065_v61 = vpack.c.bf16 %v2716_v57, %v2716_v57  ;;  %3517 = vst [vmem:[%s5070_s15 + $0x138] sm:$0xff] %v4062_v59  ;;  %v2715_v0 = vadd.f32 %v5064_v45, %v1565_v62 }
 0x1dc   : > { %v1894_v1 = vpop.f32.mrf.mxu1  ;;  %v1569_v3 = vpop.f32.mrf.mxu0 }
 0x1dd   : > { %3520 = vst [vmem:[%s5070_s15 + $0x14c] sm:$0xf] %v4065_v61  ;;  %v2719_v2 = vadd.f32 %v5057_v41, %v1894_v1  ;;  %v4064_v4 = vpack.c.bf16 %v2715_v0, %v2714_v63  ;;  %v2717_v8 = vadd.f32 %v5062_v44, %v1569_v3 }
 0x1de   : > { %v1896_v5 = vpop.f32.mrf.mxu1  ;;  %v1571_v7 = vpop.f32.mrf.mxu0 }
 0x1df   : > { %v4067_v6 = vpack.c.bf16 %v2719_v2, %v2719_v2  ;;  %3519 = vst [vmem:[%s5070_s15 + $0x144] sm:$0xff] %v4064_v4  ;;  %v2718_v9 = vadd.f32 %v5064_v45, %v1571_v7 }
 0x1e0   : > { %v1897_v10 = vpop.f32.mrf.mxu1  ;;  %v1573_v12 = vpop.f32.mrf.mxu0 }
 0x1e1   : > { %3522 = vst [vmem:[%s5070_s15 + $0x158] sm:$0xf] %v4067_v6  ;;  %v2722_v11 = vadd.f32 %v5057_v41, %v1897_v10  ;;  %v4066_v13 = vpack.c.bf16 %v2718_v9, %v2717_v8  ;;  %v2720_v17 = vadd.f32 %v5062_v44, %v1573_v12 }
 0x1e2   : > { %v1899_v14 = vpop.f32.mrf.mxu1  ;;  %v1575_v16 = vpop.f32.mrf.mxu0 }
 0x1e3   : > { %v4069_v15 = vpack.c.bf16 %v2722_v11, %v2722_v11  ;;  %3521 = vst [vmem:[%s5070_s15 + $0x150] sm:$0xff] %v4066_v13  ;;  %v2721_v18 = vadd.f32 %v5064_v45, %v1575_v16 }
 0x1e4   : > { %v1902_v19 = vpop.f32.mrf.mxu1  ;;  %v1579_v21 = vpop.f32.mrf.mxu0 }
 0x1e5   : > { %3524 = vst [vmem:[%s5070_s15 + $0x164] sm:$0xf] %v4069_v15  ;;  %v2725_v20 = vadd.f32 %v5057_v41, %v1902_v19  ;;  %v4068_v22 = vpack.c.bf16 %v2721_v18, %v2720_v17  ;;  %v2723_v26 = vadd.f32 %v5062_v44, %v1579_v21 }
 0x1e6   : > { %v1904_v23 = vpop.f32.mrf.mxu1  ;;  %v1581_v25 = vpop.f32.mrf.mxu0 }
 0x1e7   : > { %v4071_v24 = vpack.c.bf16 %v2725_v20, %v2725_v20  ;;  %3523 = vst [vmem:[%s5070_s15 + $0x15c] sm:$0xff] %v4068_v22  ;;  %v2724_v27 = vadd.f32 %v5064_v45, %v1581_v25 }
 0x1e8   : > { %v1905_v28 = vpop.f32.mrf.mxu1  ;;  %v1583_v30 = vpop.f32.mrf.mxu0 }
 0x1e9   : > { %3526 = vst [vmem:[%s5070_s15 + $0x170] sm:$0xf] %v4071_v24  ;;  %v2728_v29 = vadd.f32 %v5057_v41, %v1905_v28  ;;  %v4070_v31 = vpack.c.bf16 %v2724_v27, %v2723_v26  ;;  %v2726_v35 = vadd.f32 %v5062_v44, %v1583_v30 }
 0x1ea   : > { %v1907_v32 = vpop.f32.mrf.mxu1  ;;  %v1585_v34 = vpop.f32.mrf.mxu0 }
 0x1eb   : > { %v4073_v33 = vpack.c.bf16 %v2728_v29, %v2728_v29  ;;  %3525 = vst [vmem:[%s5070_s15 + $0x168] sm:$0xff] %v4070_v31  ;;  %v2727_v36 = vadd.f32 %v5064_v45, %v1585_v34 }
 0x1ec   : > { %v1910_v37 = vpop.f32.mrf.mxu1  ;;  %v1589_v39 = vpop.f32.mrf.mxu0 }
 0x1ed   : > { %3528 = vst [vmem:[%s5070_s15 + $0x17c] sm:$0xf] %v4073_v33  ;;  %v2731_v38 = vadd.f32 %v5057_v41, %v1910_v37  ;;  %v4072_v40 = vpack.c.bf16 %v2727_v36, %v2726_v35  ;;  %v2729_v47 = vadd.f32 %v5062_v44, %v1589_v39 }
 0x1ee   : > { %v1912_v42 = vpop.f32.mrf.mxu1  ;;  %v1591_v46 = vpop.f32.mrf.mxu0 }
 0x1ef   : > { %v4075_v43 = vpack.c.bf16 %v2731_v38, %v2731_v38  ;;  %3527 = vst [vmem:[%s5070_s15 + $0x174] sm:$0xff] %v4072_v40  ;;  %v2730_v48 = vadd.f32 %v5064_v45, %v1591_v46 }
 0x1f0   : > { %v1913_v49 = vpop.f32.mrf.mxu1  ;;  %v1593_v51 = vpop.f32.mrf.mxu0 }
 0x1f1   : > { %3530 = vst [vmem:[%s5070_s15 + $0x188] sm:$0xf] %v4075_v43  ;;  %v2734_v50 = vadd.f32 %v5057_v41, %v1913_v49  ;;  %v4074_v52 = vpack.c.bf16 %v2730_v48, %v2729_v47  ;;  %v2732_v56 = vadd.f32 %v5062_v44, %v1593_v51 }
 0x1f2   : > { %v1915_v53 = vpop.f32.mrf.mxu1  ;;  %v1595_v55 = vpop.f32.mrf.mxu0 }
 0x1f3   : > { %v4077_v54 = vpack.c.bf16 %v2734_v50, %v2734_v50  ;;  %3529 = vst [vmem:[%s5070_s15 + $0x180] sm:$0xff] %v4074_v52  ;;  %v2733_v57 = vadd.f32 %v5064_v45, %v1595_v55 }
 0x1f4   : > { %v1918_v58 = vpop.f32.mrf.mxu1  ;;  %v1599_v60 = vpop.f32.mrf.mxu0 }
 0x1f5   : > { %3532 = vst [vmem:[%s5070_s15 + $0x194] sm:$0xf] %v4077_v54  ;;  %v2737_v59 = vadd.f32 %v5057_v41, %v1918_v58  ;;  %v4076_v61 = vpack.c.bf16 %v2733_v57, %v2732_v56  ;;  %v2735_v1 = vadd.f32 %v5062_v44, %v1599_v60 }
 0x1f6   : > { %v1920_v62 = vpop.f32.mrf.mxu1  ;;  %v1601_v0 = vpop.f32.mrf.mxu0 }
 0x1f7   : > { %v4079_v63 = vpack.c.bf16 %v2737_v59, %v2737_v59  ;;  %3531 = vst [vmem:[%s5070_s15 + $0x18c] sm:$0xff] %v4076_v61  ;;  %v2736_v2 = vadd.f32 %v5064_v45, %v1601_v0 }
 0x1f8   : > { %v1921_v3 = vpop.f32.mrf.mxu1  ;;  %v1603_v5 = vpop.f32.mrf.mxu0 }
 0x1f9   : > { %3534 = vst [vmem:[%s5070_s15 + $0x1a0] sm:$0xf] %v4079_v63  ;;  %v2740_v4 = vadd.f32 %v5057_v41, %v1921_v3  ;;  %v4078_v6 = vpack.c.bf16 %v2736_v2, %v2735_v1  ;;  %v2738_v10 = vadd.f32 %v5062_v44, %v1603_v5 }
 0x1fa   : > { %v1923_v7 = vpop.f32.mrf.mxu1  ;;  %v1605_v9 = vpop.f32.mrf.mxu0 }
 0x1fb   : > { %v4081_v8 = vpack.c.bf16 %v2740_v4, %v2740_v4  ;;  %3533 = vst [vmem:[%s5070_s15 + $0x198] sm:$0xff] %v4078_v6  ;;  %v2739_v11 = vadd.f32 %v5064_v45, %v1605_v9 }
 0x1fc   : > { %v1926_v12 = vpop.f32.mrf.mxu1  ;;  %v1609_v14 = vpop.f32.mrf.mxu0 }
 0x1fd   : > { %3536 = vst [vmem:[%s5070_s15 + $0x1ac] sm:$0xf] %v4081_v8  ;;  %v2743_v13 = vadd.f32 %v5057_v41, %v1926_v12  ;;  %v4080_v15 = vpack.c.bf16 %v2739_v11, %v2738_v10  ;;  %v2741_v19 = vadd.f32 %v5062_v44, %v1609_v14 }
 0x1fe   : > { %v1928_v16 = vpop.f32.mrf.mxu1  ;;  %v1611_v18 = vpop.f32.mrf.mxu0 }
 0x1ff   : > { %v4083_v17 = vpack.c.bf16 %v2743_v13, %v2743_v13  ;;  %3535 = vst [vmem:[%s5070_s15 + $0x1a4] sm:$0xff] %v4080_v15  ;;  %v2742_v20 = vadd.f32 %v5064_v45, %v1611_v18 }
 0x200   : > { %v1929_v21 = vpop.f32.mrf.mxu1  ;;  %v1613_v23 = vpop.f32.mrf.mxu0 }
 0x201   : > { %3538 = vst [vmem:[%s5070_s15 + $0x1b8] sm:$0xf] %v4083_v17  ;;  %v2746_v22 = vadd.f32 %v5057_v41, %v1929_v21  ;;  %v4082_v24 = vpack.c.bf16 %v2742_v20, %v2741_v19  ;;  %v2744_v28 = vadd.f32 %v5062_v44, %v1613_v23 }
 0x202   : > { %v1931_v25 = vpop.f32.mrf.mxu1  ;;  %v1615_v27 = vpop.f32.mrf.mxu0 }
 0x203   : > { %v4085_v26 = vpack.c.bf16 %v2746_v22, %v2746_v22  ;;  %3537 = vst [vmem:[%s5070_s15 + $0x1b0] sm:$0xff] %v4082_v24  ;;  %v2745_v29 = vadd.f32 %v5064_v45, %v1615_v27 }
 0x204   : > { %v1934_v30 = vpop.f32.mrf.mxu1  ;;  %v1619_v32 = vpop.f32.mrf.mxu0 }
 0x205   : > { %3540 = vst [vmem:[%s5070_s15 + $0x1c4] sm:$0xf] %v4085_v26  ;;  %v2749_v31 = vadd.f32 %v5057_v41, %v1934_v30  ;;  %v4084_v33 = vpack.c.bf16 %v2745_v29, %v2744_v28  ;;  %v2747_v37 = vadd.f32 %v5062_v44, %v1619_v32 }
 0x206   : > { %v1936_v34 = vpop.f32.mrf.mxu1  ;;  %v1621_v36 = vpop.f32.mrf.mxu0 }
 0x207   : > { %v4087_v35 = vpack.c.bf16 %v2749_v31, %v2749_v31  ;;  %3539 = vst [vmem:[%s5070_s15 + $0x1bc] sm:$0xff] %v4084_v33  ;;  %v2748_v38 = vadd.f32 %v5064_v45, %v1621_v36 }
 0x208   : > { %v1937_v39 = vpop.f32.mrf.mxu1  ;;  %v1623_v42 = vpop.f32.mrf.mxu0 }
 0x209   : > { %3542 = vst [vmem:[%s5070_s15 + $0x1d0] sm:$0xf] %v4087_v35  ;;  %v2752_v40 = vadd.f32 %v5057_v41, %v1937_v39  ;;  %v4086_v43 = vpack.c.bf16 %v2748_v38, %v2747_v37  ;;  %v2750_v49 = vadd.f32 %v5062_v44, %v1623_v42 }
 0x20a   : > { %v1939_v46 = vpop.f32.mrf.mxu1  ;;  %v1625_v48 = vpop.f32.mrf.mxu0 }
 0x20b   : > { %v4089_v47 = vpack.c.bf16 %v2752_v40, %v2752_v40  ;;  %3541 = vst [vmem:[%s5070_s15 + $0x1c8] sm:$0xff] %v4086_v43  ;;  %v2751_v50 = vadd.f32 %v5064_v45, %v1625_v48 }
 0x20c   : > { %v1942_v51 = vpop.f32.mrf.mxu1  ;;  %v1629_v53 = vpop.f32.mrf.mxu0 }
 0x20d   : > { %3544 = vst [vmem:[%s5070_s15 + $0x1dc] sm:$0xf] %v4089_v47  ;;  %v2755_v52 = vadd.f32 %v5057_v41, %v1942_v51  ;;  %v4088_v54 = vpack.c.bf16 %v2751_v50, %v2750_v49  ;;  %v2753_v58 = vadd.f32 %v5062_v44, %v1629_v53 }
 0x20e   : > { %v1944_v55 = vpop.f32.mrf.mxu1  ;;  %v1631_v57 = vpop.f32.mrf.mxu0 }
 0x20f   : > { %v4091_v56 = vpack.c.bf16 %v2755_v52, %v2755_v52  ;;  %3543 = vst [vmem:[%s5070_s15 + $0x1d4] sm:$0xff] %v4088_v54  ;;  %v2754_v59 = vadd.f32 %v5064_v45, %v1631_v57 }
 0x210   : > { %v1945_v60 = vpop.f32.mrf.mxu1  ;;  %v1633_v62 = vpop.f32.mrf.mxu0 }
 0x211   : > { %3546 = vst [vmem:[%s5070_s15 + $0x1e8] sm:$0xf] %v4091_v56  ;;  %v2758_v61 = vadd.f32 %v5057_v41, %v1945_v60  ;;  %v4090_v63 = vpack.c.bf16 %v2754_v59, %v2753_v58  ;;  %v2756_v3 = vadd.f32 %v5062_v44, %v1633_v62 }
 0x212   : > { %v1947_v0 = vpop.f32.mrf.mxu1  ;;  %v1635_v2 = vpop.f32.mrf.mxu0 }
 0x213   : > { %v4093_v1 = vpack.c.bf16 %v2758_v61, %v2758_v61  ;;  %3545 = vst [vmem:[%s5070_s15 + $0x1e0] sm:$0xff] %v4090_v63  ;;  %v2757_v4 = vadd.f32 %v5064_v45, %v1635_v2 }
 0x214   : > { %v1950_v5 = vpop.f32.mrf.mxu1  ;;  %v1639_v7 = vpop.f32.mrf.mxu0 }
 0x215   : > { %3548 = vst [vmem:[%s5070_s15 + $0x1f4] sm:$0xf] %v4093_v1  ;;  %v2761_v6 = vadd.f32 %v5057_v41, %v1950_v5  ;;  %v4092_v8 = vpack.c.bf16 %v2757_v4, %v2756_v3  ;;  %v2759_v12 = vadd.f32 %v5062_v44, %v1639_v7 }
 0x216   : > { %v1952_v9 = vpop.f32.mrf.mxu1  ;;  %v1641_v11 = vpop.f32.mrf.mxu0 }
 0x217   : > { %v4095_v10 = vpack.c.bf16 %v2761_v6, %v2761_v6  ;;  %3547 = vst [vmem:[%s5070_s15 + $0x1ec] sm:$0xff] %v4092_v8  ;;  %v2760_v13 = vadd.f32 %v5064_v45, %v1641_v11 }
 0x218   : > { %v1953_v14 = vpop.f32.mrf.mxu1  ;;  %v1643_v16 = vpop.f32.mrf.mxu0 }
 0x219   : > { %3550 = vst [vmem:[%s5070_s15 + $0x200] sm:$0xf] %v4095_v10  ;;  %v2764_v15 = vadd.f32 %v5057_v41, %v1953_v14  ;;  %v4094_v17 = vpack.c.bf16 %v2760_v13, %v2759_v12  ;;  %v2762_v21 = vadd.f32 %v5062_v44, %v1643_v16 }
 0x21a   : > { %v1955_v18 = vpop.f32.mrf.mxu1  ;;  %v1645_v20 = vpop.f32.mrf.mxu0 }
 0x21b   : > { %v4097_v19 = vpack.c.bf16 %v2764_v15, %v2764_v15  ;;  %3549 = vst [vmem:[%s5070_s15 + $0x1f8] sm:$0xff] %v4094_v17  ;;  %v2763_v22 = vadd.f32 %v5064_v45, %v1645_v20 }
 0x21c   : > { %v1958_v23 = vpop.f32.mrf.mxu1  ;;  %v1649_v25 = vpop.f32.mrf.mxu0 }
 0x21d   : > { %3552 = vst [vmem:[%s5070_s15 + $0x20c] sm:$0xf] %v4097_v19  ;;  %v2767_v24 = vadd.f32 %v5057_v41, %v1958_v23  ;;  %v4096_v26 = vpack.c.bf16 %v2763_v22, %v2762_v21  ;;  %v2765_v30 = vadd.f32 %v5062_v44, %v1649_v25 }
 0x21e   : > { %v1960_v27 = vpop.f32.mrf.mxu1  ;;  %v1651_v29 = vpop.f32.mrf.mxu0 }
 0x21f   : > { %v4099_v28 = vpack.c.bf16 %v2767_v24, %v2767_v24  ;;  %3551 = vst [vmem:[%s5070_s15 + $0x204] sm:$0xff] %v4096_v26  ;;  %v2766_v31 = vadd.f32 %v5064_v45, %v1651_v29 }
 0x220   : > { %v1961_v32 = vpop.f32.mrf.mxu1  ;;  %v1653_v34 = vpop.f32.mrf.mxu0 }
 0x221   : > { %3554 = vst [vmem:[%s5070_s15 + $0x218] sm:$0xf] %v4099_v28  ;;  %v2770_v33 = vadd.f32 %v5057_v41, %v1961_v32  ;;  %v4098_v35 = vpack.c.bf16 %v2766_v31, %v2765_v30  ;;  %v2768_v39 = vadd.f32 %v5062_v44, %v1653_v34 }
 0x222   : > { %v1963_v36 = vpop.f32.mrf.mxu1  ;;  %v1655_v38 = vpop.f32.mrf.mxu0 }
 0x223   : > { %v4101_v37 = vpack.c.bf16 %v2770_v33, %v2770_v33  ;;  %3553 = vst [vmem:[%s5070_s15 + $0x210] sm:$0xff] %v4098_v35  ;;  %v2769_v40 = vadd.f32 %v5064_v45, %v1655_v38 }
 0x224   : > { %v1966_v42 = vpop.f32.mrf.mxu1  ;;  %v1659_v46 = vpop.f32.mrf.mxu0 }
 0x225   : > { %3556 = vst [vmem:[%s5070_s15 + $0x224] sm:$0xf] %v4101_v37  ;;  %v2773_v43 = vadd.f32 %v5057_v41, %v1966_v42  ;;  %v4100_v47 = vpack.c.bf16 %v2769_v40, %v2768_v39  ;;  %v2771_v51 = vadd.f32 %v5062_v44, %v1659_v46 }
 0x226   : > { %v1968_v48 = vpop.f32.mrf.mxu1  ;;  %v1661_v50 = vpop.f32.mrf.mxu0 }
 0x227   : > { %v4103_v49 = vpack.c.bf16 %v2773_v43, %v2773_v43  ;;  %3555 = vst [vmem:[%s5070_s15 + $0x21c] sm:$0xff] %v4100_v47  ;;  %v2772_v52 = vadd.f32 %v5064_v45, %v1661_v50 }
 0x228   : > { %v1969_v53 = vpop.f32.mrf.mxu1  ;;  %v1663_v55 = vpop.f32.mrf.mxu0 }
 0x229   : > { %3558 = vst [vmem:[%s5070_s15 + $0x230] sm:$0xf] %v4103_v49  ;;  %v2776_v54 = vadd.f32 %v5057_v41, %v1969_v53  ;;  %v4102_v56 = vpack.c.bf16 %v2772_v52, %v2771_v51  ;;  %v2774_v60 = vadd.f32 %v5062_v44, %v1663_v55 }
 0x22a   : > { %v1971_v57 = vpop.f32.mrf.mxu1  ;;  %v1665_v59 = vpop.f32.mrf.mxu0 }
 0x22b   : > { %v4105_v58 = vpack.c.bf16 %v2776_v54, %v2776_v54  ;;  %3557 = vst [vmem:[%s5070_s15 + $0x228] sm:$0xff] %v4102_v56  ;;  %v2775_v61 = vadd.f32 %v5064_v45, %v1665_v59 }
 0x22c   : > { %v1974_v62 = vpop.f32.mrf.mxu1  ;;  %v1669_v0 = vpop.f32.mrf.mxu0 }
 0x22d   : > { %3560 = vst [vmem:[%s5070_s15 + $0x23c] sm:$0xf] %v4105_v58  ;;  %v2779_v63 = vadd.f32 %v5057_v41, %v1974_v62  ;;  %v4104_v1 = vpack.c.bf16 %v2775_v61, %v2774_v60  ;;  %v2777_v5 = vadd.f32 %v5062_v44, %v1669_v0 }
 0x22e   : > { %v1976_v2 = vpop.f32.mrf.mxu1  ;;  %v1671_v4 = vpop.f32.mrf.mxu0 }
 0x22f   : > { %v4107_v3 = vpack.c.bf16 %v2779_v63, %v2779_v63  ;;  %3559 = vst [vmem:[%s5070_s15 + $0x234] sm:$0xff] %v4104_v1  ;;  %v2778_v6 = vadd.f32 %v5064_v45, %v1671_v4 }
 0x230   : > { %v1977_v7 = vpop.f32.mrf.mxu1  ;;  %v1673_v9 = vpop.f32.mrf.mxu0 }
 0x231   : > { %3562 = vst [vmem:[%s5070_s15 + $0x248] sm:$0xf] %v4107_v3  ;;  %v2782_v8 = vadd.f32 %v5057_v41, %v1977_v7  ;;  %v4106_v10 = vpack.c.bf16 %v2778_v6, %v2777_v5  ;;  %v2780_v14 = vadd.f32 %v5062_v44, %v1673_v9 }
 0x232   : > { %v1979_v11 = vpop.f32.mrf.mxu1  ;;  %v1675_v13 = vpop.f32.mrf.mxu0 }
 0x233   : > { %v4109_v12 = vpack.c.bf16 %v2782_v8, %v2782_v8  ;;  %3561 = vst [vmem:[%s5070_s15 + $0x240] sm:$0xff] %v4106_v10  ;;  %v2781_v15 = vadd.f32 %v5064_v45, %v1675_v13 }
 0x234   : > { %v1982_v16 = vpop.f32.mrf.mxu1  ;;  %v1679_v18 = vpop.f32.mrf.mxu0 }
 0x235   : > { %3564 = vst [vmem:[%s5070_s15 + $0x254] sm:$0xf] %v4109_v12  ;;  %v2785_v17 = vadd.f32 %v5057_v41, %v1982_v16  ;;  %v4108_v19 = vpack.c.bf16 %v2781_v15, %v2780_v14  ;;  %v2783_v23 = vadd.f32 %v5062_v44, %v1679_v18 }
 0x236   : > { %v1984_v20 = vpop.f32.mrf.mxu1  ;;  %v1681_v22 = vpop.f32.mrf.mxu0 }
 0x237   : > { %v4111_v21 = vpack.c.bf16 %v2785_v17, %v2785_v17  ;;  %3563 = vst [vmem:[%s5070_s15 + $0x24c] sm:$0xff] %v4108_v19  ;;  %v2784_v24 = vadd.f32 %v5064_v45, %v1681_v22 }
 0x238   : > { %v1985_v25 = vpop.f32.mrf.mxu1  ;;  %v1683_v27 = vpop.f32.mrf.mxu0 }
 0x239   : > { %3566 = vst [vmem:[%s5070_s15 + $0x260] sm:$0xf] %v4111_v21  ;;  %v2788_v26 = vadd.f32 %v5057_v41, %v1985_v25  ;;  %v4110_v28 = vpack.c.bf16 %v2784_v24, %v2783_v23  ;;  %v2786_v32 = vadd.f32 %v5062_v44, %v1683_v27 }
 0x23a   : > { %v1987_v29 = vpop.f32.mrf.mxu1  ;;  %v1685_v31 = vpop.f32.mrf.mxu0 }
 0x23b   : > { %v4113_v30 = vpack.c.bf16 %v2788_v26, %v2788_v26  ;;  %3565 = vst [vmem:[%s5070_s15 + $0x258] sm:$0xff] %v4110_v28  ;;  %v2787_v33 = vadd.f32 %v5064_v45, %v1685_v31 }
 0x23c   : > { %v1990_v34 = vpop.f32.mrf.mxu1  ;;  %v1689_v36 = vpop.f32.mrf.mxu0 }
 0x23d   : > { %3568 = vst [vmem:[%s5070_s15 + $0x26c] sm:$0xf] %v4113_v30  ;;  %v2791_v35 = vadd.f32 %v5057_v41, %v1990_v34  ;;  %v4112_v37 = vpack.c.bf16 %v2787_v33, %v2786_v32  ;;  %v2789_v42 = vadd.f32 %v5062_v44, %v1689_v36 }
 0x23e   : > { %v1992_v38 = vpop.f32.mrf.mxu1  ;;  %v1691_v40 = vpop.f32.mrf.mxu0 }
 0x23f   : > { %v4115_v39 = vpack.c.bf16 %v2791_v35, %v2791_v35  ;;  %3567 = vst [vmem:[%s5070_s15 + $0x264] sm:$0xff] %v4112_v37  ;;  %v2790_v43 = vadd.f32 %v5064_v45, %v1691_v40 }
 0x240   : > { %v1993_v46 = vpop.f32.mrf.mxu1  ;;  %v1693_v48 = vpop.f32.mrf.mxu0 }
 0x241   : > { %3570 = vst [vmem:[%s5070_s15 + $0x278] sm:$0xf] %v4115_v39  ;;  %v2794_v47 = vadd.f32 %v5057_v41, %v1993_v46  ;;  %v4114_v49 = vpack.c.bf16 %v2790_v43, %v2789_v42  ;;  %v2792_v53 = vadd.f32 %v5062_v44, %v1693_v48 }
 0x242   : > { %v1995_v50 = vpop.f32.mrf.mxu1  ;;  %v1695_v52 = vpop.f32.mrf.mxu0 }
 0x243   : > { %v4117_v51 = vpack.c.bf16 %v2794_v47, %v2794_v47  ;;  %3569 = vst [vmem:[%s5070_s15 + $0x270] sm:$0xff] %v4114_v49  ;;  %v2793_v54 = vadd.f32 %v5064_v45, %v1695_v52 }
 0x244   : > { %v1998_v55 = vpop.f32.mrf.mxu1  ;;  %v1699_v57 = vpop.f32.mrf.mxu0 }
 0x245   : > { %3572 = vst [vmem:[%s5070_s15 + $0x284] sm:$0xf] %v4117_v51  ;;  %v2797_v56 = vadd.f32 %v5057_v41, %v1998_v55  ;;  %v4116_v58 = vpack.c.bf16 %v2793_v54, %v2792_v53  ;;  %v2795_v62 = vadd.f32 %v5062_v44, %v1699_v57 }
 0x246   : > { %v2000_v59 = vpop.f32.mrf.mxu1  ;;  %v1701_v61 = vpop.f32.mrf.mxu0 }
 0x247   : > { %v4119_v60 = vpack.c.bf16 %v2797_v56, %v2797_v56  ;;  %3571 = vst [vmem:[%s5070_s15 + $0x27c] sm:$0xff] %v4116_v58  ;;  %v2796_v63 = vadd.f32 %v5064_v45, %v1701_v61 }
 0x248   : > { %v2001_v0 = vpop.f32.mrf.mxu1  ;;  %v1703_v2 = vpop.f32.mrf.mxu0 }
 0x249   : > { %3574 = vst [vmem:[%s5070_s15 + $0x290] sm:$0xf] %v4119_v60  ;;  %v2800_v1 = vadd.f32 %v5057_v41, %v2001_v0  ;;  %v4118_v3 = vpack.c.bf16 %v2796_v63, %v2795_v62  ;;  %v2798_v7 = vadd.f32 %v5062_v44, %v1703_v2 }
 0x24a   : > { %v2003_v4 = vpop.f32.mrf.mxu1  ;;  %v1705_v6 = vpop.f32.mrf.mxu0 }
 0x24b   : > { %v4121_v5 = vpack.c.bf16 %v2800_v1, %v2800_v1  ;;  %3573 = vst [vmem:[%s5070_s15 + $0x288] sm:$0xff] %v4118_v3  ;;  %v2799_v8 = vadd.f32 %v5064_v45, %v1705_v6 }
 0x24c   : > { %v2006_v9 = vpop.f32.mrf.mxu1  ;;  %v1709_v11 = vpop.f32.mrf.mxu0 }
 0x24d   : > { %3576 = vst [vmem:[%s5070_s15 + $0x29c] sm:$0xf] %v4121_v5  ;;  %v2803_v10 = vadd.f32 %v5057_v41, %v2006_v9  ;;  %v4120_v12 = vpack.c.bf16 %v2799_v8, %v2798_v7  ;;  %v2801_v16 = vadd.f32 %v5062_v44, %v1709_v11 }
 0x24e   : > { %v2008_v13 = vpop.f32.mrf.mxu1  ;;  %v1711_v15 = vpop.f32.mrf.mxu0 }
 0x24f   : > { %v4123_v14 = vpack.c.bf16 %v2803_v10, %v2803_v10  ;;  %3575 = vst [vmem:[%s5070_s15 + $0x294] sm:$0xff] %v4120_v12  ;;  %v2802_v17 = vadd.f32 %v5064_v45, %v1711_v15 }
 0x250   : > { %v2009_v18 = vpop.f32.mrf.mxu1  ;;  %v1713_v20 = vpop.f32.mrf.mxu0 }
 0x251   : > { %3578 = vst [vmem:[%s5070_s15 + $0x2a8] sm:$0xf] %v4123_v14  ;;  %v2806_v19 = vadd.f32 %v5057_v41, %v2009_v18  ;;  %v4122_v21 = vpack.c.bf16 %v2802_v17, %v2801_v16  ;;  %v2804_v25 = vadd.f32 %v5062_v44, %v1713_v20 }
 0x252   : > { %v2011_v22 = vpop.f32.mrf.mxu1  ;;  %v1715_v24 = vpop.f32.mrf.mxu0 }
 0x253   : > { %v4125_v23 = vpack.c.bf16 %v2806_v19, %v2806_v19  ;;  %3577 = vst [vmem:[%s5070_s15 + $0x2a0] sm:$0xff] %v4122_v21  ;;  %v2805_v26 = vadd.f32 %v5064_v45, %v1715_v24 }
 0x254   : > { %v2014_v27 = vpop.f32.mrf.mxu1  ;;  %v1719_v29 = vpop.f32.mrf.mxu0 }
 0x255   : > { %3580 = vst [vmem:[%s5070_s15 + $0x2b4] sm:$0xf] %v4125_v23  ;;  %v2809_v28 = vadd.f32 %v5057_v41, %v2014_v27  ;;  %v4124_v30 = vpack.c.bf16 %v2805_v26, %v2804_v25  ;;  %v2807_v34 = vadd.f32 %v5062_v44, %v1719_v29 }
 0x256   : > { %v2016_v31 = vpop.f32.mrf.mxu1  ;;  %v1721_v33 = vpop.f32.mrf.mxu0 }
 0x257   : > { %v4127_v32 = vpack.c.bf16 %v2809_v28, %v2809_v28  ;;  %3579 = vst [vmem:[%s5070_s15 + $0x2ac] sm:$0xff] %v4124_v30  ;;  %v2808_v35 = vadd.f32 %v5064_v45, %v1721_v33 }
 0x258   : > { %v2017_v36 = vpop.f32.mrf.mxu1  ;;  %v1723_v38 = vpop.f32.mrf.mxu0 }
 0x259   : > { %3582 = vst [vmem:[%s5070_s15 + $0x2c0] sm:$0xf] %v4127_v32  ;;  %v2812_v37 = vadd.f32 %v5057_v41, %v2017_v36  ;;  %v4126_v39 = vpack.c.bf16 %v2808_v35, %v2807_v34  ;;  %v2810_v46 = vadd.f32 %v5062_v44, %v1723_v38 }
 0x25a   : > { %v2019_v40 = vpop.f32.mrf.mxu1  ;;  %v1725_v43 = vpop.f32.mrf.mxu0 }
 0x25b   : > { %v4129_v42 = vpack.c.bf16 %v2812_v37, %v2812_v37  ;;  %3581 = vst [vmem:[%s5070_s15 + $0x2b8] sm:$0xff] %v4126_v39  ;;  %v2811_v47 = vadd.f32 %v5064_v45, %v1725_v43 }
 0x25c   : > { %v2022_v48 = vpop.f32.mrf.mxu1  ;;  %v1729_v50 = vpop.f32.mrf.mxu0 }
 0x25d   : > { %3584 = vst [vmem:[%s5070_s15 + $0x2cc] sm:$0xf] %v4129_v42  ;;  %v2815_v49 = vadd.f32 %v5057_v41, %v2022_v48  ;;  %v4128_v51 = vpack.c.bf16 %v2811_v47, %v2810_v46  ;;  %v2813_v55 = vadd.f32 %v5062_v44, %v1729_v50 }
 0x25e   : > { %v2024_v52 = vpop.f32.mrf.mxu1  ;;  %v1731_v54 = vpop.f32.mrf.mxu0 }
 0x25f   : > { %v4131_v53 = vpack.c.bf16 %v2815_v49, %v2815_v49  ;;  %3583 = vst [vmem:[%s5070_s15 + $0x2c4] sm:$0xff] %v4128_v51  ;;  %v2814_v56 = vadd.f32 %v5064_v45, %v1731_v54 }
 0x260   : > { %v2025_v57 = vpop.f32.mrf.mxu1  ;;  %v1733_v59 = vpop.f32.mrf.mxu0 }
 0x261   : > { %3586 = vst [vmem:[%s5070_s15 + $0x2d8] sm:$0xf] %v4131_v53  ;;  %v2818_v58 = vadd.f32 %v5057_v41, %v2025_v57  ;;  %v4130_v60 = vpack.c.bf16 %v2814_v56, %v2813_v55  ;;  %v2816_v0 = vadd.f32 %v5062_v44, %v1733_v59 }
 0x262   : > { %v2027_v61 = vpop.f32.mrf.mxu1  ;;  %v1735_v63 = vpop.f32.mrf.mxu0 }
 0x263   : > { %v4133_v62 = vpack.c.bf16 %v2818_v58, %v2818_v58  ;;  %3585 = vst [vmem:[%s5070_s15 + $0x2d0] sm:$0xff] %v4130_v60  ;;  %v2817_v1 = vadd.f32 %v5064_v45, %v1735_v63 }
 0x264   : > { %v2030_v2 = vpop.f32.mrf.mxu1  ;;  %v1739_v4 = vpop.f32.mrf.mxu0 }
 0x265   : > { %3588 = vst [vmem:[%s5070_s15 + $0x2e4] sm:$0xf] %v4133_v62  ;;  %v2821_v3 = vadd.f32 %v5057_v41, %v2030_v2  ;;  %v4132_v5 = vpack.c.bf16 %v2817_v1, %v2816_v0  ;;  %v2819_v9 = vadd.f32 %v5062_v44, %v1739_v4 }
 0x266   : > { %v2032_v6 = vpop.f32.mrf.mxu1  ;;  %v1741_v8 = vpop.f32.mrf.mxu0 }
 0x267   : > { %v4135_v7 = vpack.c.bf16 %v2821_v3, %v2821_v3  ;;  %3587 = vst [vmem:[%s5070_s15 + $0x2dc] sm:$0xff] %v4132_v5  ;;  %v2820_v10 = vadd.f32 %v5064_v45, %v1741_v8 }
 0x268   : > { %v2033_v11 = vpop.f32.mrf.mxu1  ;;  %v1743_v13 = vpop.f32.mrf.mxu0 }
 0x269   : > { %3590 = vst [vmem:[%s5070_s15 + $0x2f0] sm:$0xf] %v4135_v7  ;;  %v2824_v12 = vadd.f32 %v5057_v41, %v2033_v11  ;;  %v4134_v14 = vpack.c.bf16 %v2820_v10, %v2819_v9  ;;  %v2822_v18 = vadd.f32 %v5062_v44, %v1743_v13 }
 0x26a   : > { %v2035_v15 = vpop.f32.mrf.mxu1  ;;  %v1745_v17 = vpop.f32.mrf.mxu0 }
 0x26b   : > { %v4137_v16 = vpack.c.bf16 %v2824_v12, %v2824_v12  ;;  %3589 = vst [vmem:[%s5070_s15 + $0x2e8] sm:$0xff] %v4134_v14  ;;  %v2823_v19 = vadd.f32 %v5064_v45, %v1745_v17 }
 0x26d   : > { %3592 = vst [vmem:[%s5070_s15 + $0x2fc] sm:$0xf] %v4137_v16  ;;  %v4136_v41 = vpack.c.bf16 %v2823_v19, %v2822_v18 }
 0x26f   : > { %3591 = vst [vmem:[%s5070_s15 + $0x2f4] sm:$0xff] %v4136_v41 }
 0x270   : > { %4546 = shalt.err (!%p4543_p9)
}
 0x271   : > { %s4547_s5 = scalar_lea.hbm %s5405_s12, 12288  ;;  %s4551_s29 = scalar_lea.hbm %s5534_s3, 98304 }
 0x272   : > { %p4548_p10 = scmp.ne.s32.totalorder %s5405_s12, %s4547_s5  ;;  %p4552_p12 = scmp.lt.s32.totalorder %s5405_s12, %s5534_s3 }
 0x273   : > { %p4553_p0 = scmp.lt.s32.totalorder %s4551_s29, %s4547_s5 }
 0x274   : > { %p4549_p11 = pnand %p4548_p10, %p4882_p2 }
 0x275   : > { %p4554_p4 = por %p4553_p0, %p4552_p12 }
 0x276   : > { %p4550_p3 = pneg %p4549_p11 }
 0x278   : > { %p4555_p5 = pnand %p4554_p4, %p4550_p3 }
 0x27a   : > { %4558 = shalt.err (!%p4555_p5)
}
 0x27b   : > { %s4693_s15 = smov 192   ;;  %s4694_s22 = smov 384  }
 0x27c   : > { %s4695_s27 = smov 12  }
 0x27d   : > { %4150 = dma.vmem_to_hbm [thread:$0]  (%p4882_p2), %s5408_s18, 12288, %s5405_s12, %s5413_s14, %s4693_s15, %s4694_s22, %s4695_s27  }
 0x27e PF: > { %s5535_s7 = sld [smem:[#allocation13_spill]]  ;;  %p4167_p7 = scmp.ge.s32.totalorder %s4681_s25, 2 }
 0x27f   : > { %p5536_p1 = scmp.ne.s32.totalorder %s5527_s6, 0 }
 0x281   : > { %p4163_p8 = pnand %p4167_p7, %p5536_p1 }
 0x283   : > { %p4164_p13 = pneg %p4163_p8 }
 0x284   : > { %s3625_s10 = sand.u32 1, %s5535_s7  }
 0x285   : > { %s3626_s4 = scalar_lea.sflag [#allocation5], %s3625_s10 }
 0x286   : > { %4624 = dma.done.wait (%p4164_p13), %s3626_s4, 12288  }
 0x287   : > { %4626 = vsyncadd (%p4164_p13), %s3626_s4, 4294955008  ;;  %s22_s25 = sadd.s32 1, %s4681_s25   ;;  %s5538_s9 = sld [smem:[#allocation14_spill]] }
 0x288   : > { %p5441_p6 = scmp.ge.s32.totalorder %s22_s25, 10   ;;  %s5539_s14 = sld [smem:[#allocation24_spill]] }
 0x289   : > { %s5540_s18 = sld [smem:[#allocation22_spill]]  ;;  %s5547_s12 = smov %s4633_s13 }
 0x28a   : > { %s5541_s21 = sld [smem:[#allocation15_spill]]  ;;  %s5549_s15 = smov %s4645_s16 }
 0x28b   : > { %s5542_s20 = sld [smem:[#allocation23_spill]]  ;;  %s5550_s16 = smov %s4649_s17 }
 0x28c   : > { %s5543_s6 = sld [smem:[#allocation18_spill]] }
 0x28d   : > { %s5544_s22 = sld [smem:[#allocation19_spill]]  ;;  %s5548_s13 = smov %s5538_s9 }
 0x28e   : > { %s5545_s23 = sld [smem:[#allocation20_spill]]  ;;  %21 = sbr.rel (!%p5441_p6) target bundleno = 16 (0x10), region = 109 }
 0x28f   : > { %s5546_s24 = sld [smem:[#allocation21_spill]]  ;;  %s5551_s17 = smov %s5540_s18 }
 0x290   : > { %s5552_s18 = smov %s4657_s19  ;;  %s5553_s19 = smov %s5541_s21 }
 0x292   : > { %s5554_s21 = smov %s5543_s6 }
 0x293   :  { %3631 = vsyncpa [#allocation4], 1 }
 0x294   :  { %3633 = vsyncpa [#allocation4 + $0x1], 1 }
 0x295   :  { %3634 = vsyncpa [#allocation7], 1 }
 0x296   :  { %3636 = vsyncpa [#allocation7 + $0x1], 1 }
 0x297   :  { %3637 = vsyncpa [#allocation5], 1 }
 0x298   :  { %3639 = vsyncpa [#allocation5 + $0x1], 1 }

</bundles_post_ra>
